<compile_context>
chip_gen: v7x
topology: tpu7x:2x2x1
jax: 0.10.0
libtpu: 0.0.40
codegen_flags: <defaults>
</compile_context>

<pallas_src>
import functools

import jax
import jax.numpy as jnp
from jax.experimental import pallas as pl
from jax.experimental.pallas import tpu as pltpu


def pointnet_kernel(x_ref, mask_ref,
                    w1_ref, b1_ref,
                    w2_ref, b2_ref,
                    w3_ref, b3_ref,
                    w4_ref, b4_ref,
                    w5_ref, b5_ref,
                    w6_ref, b6_ref,
                    o_ref, *, chunk_b, npad):
    # x block: (1, 3, L) f32 with L = chunk_b * npad (points of chunk_b batch elems on lanes)
    x = x_ref[0]                                                    # (3, L)

    # ---- layer 1: Conv1d(3,64,1)+BN+ReLU (BN folded), on the VPU (K=3 too shallow for MXU)
    w1 = w1_ref[...]                                                # (64, 3) f32
    h = w1[:, 0:1] * x[0:1, :]
    h = h + w1[:, 1:2] * x[1:2, :]
    h = h + w1[:, 2:3] * x[2:3, :]
    h = jnp.maximum(h + b1_ref[...], 0.0).astype(jnp.bfloat16)      # (64, L)

    # ---- layers 2-4: 1x1 convs == (C_out, C_in) @ (C_in, L) MXU matmuls, bf16 in / f32 acc
    def mxu_layer(w_ref, b_ref, a):
        y = jnp.dot(w_ref[...], a, preferred_element_type=jnp.float32) + b_ref[...]
        return jnp.maximum(y, 0.0)

    h = mxu_layer(w2_ref, b2_ref, h).astype(jnp.bfloat16)           # (64, L)
    h = mxu_layer(w3_ref, b3_ref, h).astype(jnp.bfloat16)           # (128, L)
    h = mxu_layer(w4_ref, b4_ref, h)                                # (256, L) f32 (200 real + zero pad)

    # ---- global max pool over points (== F.max_pool1d(x, 1000) when N == pool window).
    # Zero padded point columns first; safe because activations are post-ReLU >= 0.
    h = h * mask_ref[...]                                           # (1, L) validity mask

    lane_ids = jax.lax.broadcasted_iota(jnp.int32, (1, chunk_b), 1)
    g = None
    for bb in range(chunk_b):                                       # static, lane-aligned slices
        seg_max = jnp.max(h[:, bb * npad:(bb + 1) * npad], axis=1, keepdims=True)   # (256, 1)
        sel = (lane_ids == bb).astype(jnp.float32)                  # (1, chunk_b) one-hot
        contrib = seg_max * sel                                     # (256, chunk_b)
        g = contrib if g is None else g + contrib                   # assemble pooled features

    # ---- classifier head (mlp_third), batched over the chunk (lane dim = chunk_b)
    g = g.astype(jnp.bfloat16)                                      # (256, chunk_b)
    h5 = jnp.maximum(
        jnp.dot(w5_ref[...], g, preferred_element_type=jnp.float32) + b5_ref[...], 0.0)
    h5 = h5.astype(jnp.bfloat16)                                    # (128, chunk_b)
    logits = jnp.maximum(
        jnp.dot(w6_ref[...], h5, preferred_element_type=jnp.float32) + b6_ref[...], 0.0)  # (C, chunk_b)

    # ---- squeeze(2) + log_softmax over the class (sublane) axis
    m = jnp.max(logits, axis=0, keepdims=True)
    z = logits - m
    lse = jnp.log(jnp.sum(jnp.exp(z), axis=0, keepdims=True))
    o_ref[0] = z - lse                                              # (C, chunk_b)


def _replicated_spec(shape):
    n = len(shape)
    return pl.BlockSpec(shape, lambda k, n=n: (0,) * n)


def pointnet_forward(x, params):
    """x: (B, N, 3) float32 (as handed to the PyTorch forward, before its transpose(1, 2))."""
    B, N, _ = x.shape
    (w1, b1), (w2, b2), (w3, b3), (w4, b4), (w5, b5), (w6, b6) = params
    class_num = w6.shape[0]

    npad = ((N + 127) // 128) * 128                  # lane-dense point axis

    # Chunk the batch: one grid step handles chunk_b elements (L = chunk_b * npad lanes),
    # bounded so intermediates stay small; keep >= 2 parallel steps when B >= 2 (v7x: 2 TCs).
    target_lanes = 4096
    chunk_b = max(1, min(B, target_lanes // npad))
    num_chunks = -(-B // chunk_b)
    if num_chunks == 1 and B >= 2:
        chunk_b = -(-B // 2)
        num_chunks = -(-B // chunk_b)
    b_pad = num_chunks * chunk_b
    L = chunk_b * npad

    # (B, N, 3) -> (num_chunks, 3, chunk_b * npad): channels on sublanes, points on lanes.
    x_cn = jnp.transpose(x, (0, 2, 1)).astype(jnp.float32)          # (B, 3, N)
    x_cn = jnp.pad(x_cn, ((0, b_pad - B), (0, 0), (0, npad - N)))
    x_cn = x_cn.reshape(num_chunks, chunk_b, 3, npad)
    x_cn = jnp.transpose(x_cn, (0, 2, 1, 3)).reshape(num_chunks, 3, L)

    # Point-validity mask (1 for real points, 0 for lane padding); identical for every chunk.
    mask = (jnp.arange(npad) < N).astype(jnp.float32)
    mask = jnp.tile(mask, (chunk_b,)).reshape(1, L)

    # Zero-pad the 200-channel layer to 256 (inert through ReLU / max / w5's zero columns).
    c4 = w4.shape[0]
    c4p = ((c4 + 127) // 128) * 128
    w4p = jnp.pad(w4, ((0, c4p - c4), (0, 0)))
    b4p = jnp.pad(b4, ((0, c4p - c4),))
    w5p = jnp.pad(w5, ((0, 0), (0, c4p - c4)))

    def col(b):
        return b.reshape(-1, 1).astype(jnp.float32)

    weight_args = [
        w1.astype(jnp.float32), col(b1),             # layer 1 stays f32 (VPU FMAs)
        w2.astype(jnp.bfloat16), col(b2),
        w3.astype(jnp.bfloat16), col(b3),
        w4p.astype(jnp.bfloat16), col(b4p),
        w5p.astype(jnp.bfloat16), col(b5),
        w6.astype(jnp.bfloat16), col(b6),
    ]

    in_specs = [
        pl.BlockSpec((1, 3, L), lambda k: (k, 0, 0)),
        pl.BlockSpec((1, L), lambda k: (0, 0)),
    ] + [_replicated_spec(a.shape) for a in weight_args]

    kernel = functools.partial(pointnet_kernel, chunk_b=chunk_b, npad=npad)

    out = pl.pallas_call(
        kernel,
        out_shape=jax.ShapeDtypeStruct((num_chunks, class_num, chunk_b), jnp.float32),
        grid_spec=pltpu.PrefetchScalarGridSpec(
            num_scalar_prefetch=0,
            grid=(num_chunks,),
            in_specs=in_specs,
            out_specs=pl.BlockSpec((1, class_num, chunk_b), lambda k: (k, 0, 0)),
        ),
        compiler_params=pltpu.CompilerParams(
            dimension_semantics=("parallel",)),
    )(x_cn, mask, *weight_args)

    # (num_chunks, class_num, chunk_b) -> (B, class_num)
    out = jnp.transpose(out, (0, 2, 1)).reshape(b_pad, class_num)
    return out[:B]


def fold_bn(w, b, gamma, beta, mean, var, eps=1e-5):
    """Fold eval-mode BatchNorm1d into the preceding 1x1 conv."""
    scale = gamma / jnp.sqrt(var + eps)
    w_f = w * scale[:, None]
    b_f = (b - mean) * scale + beta
    return w_f, b_f


def make_params(key, class_num=10):
    """Deterministic synthetic parameters matching the PyTorch module's shapes."""
    dims = [(64, 3), (64, 64), (128, 64), (200, 128), (128, 200), (class_num, 128)]
    has_bn = [True, True, True, True, False, False]
    params = []
    for (c_out, c_in), bn in zip(dims, has_bn):
        key, kw, kb, kg, kbe, km, kv = jax.random.split(key, 7)
        w = jax.random.normal(kw, (c_out, c_in), jnp.float32) * 0.1
        b = jax.random.normal(kb, (c_out,), jnp.float32) * 0.1
        if bn:
            gamma = jax.random.uniform(kg, (c_out,), jnp.float32, 0.5, 1.5)
            beta = jax.random.normal(kbe, (c_out,), jnp.float32) * 0.1
            mean = jax.random.normal(km, (c_out,), jnp.float32) * 0.1
            var = jax.random.uniform(kv, (c_out,), jnp.float32, 0.5, 1.5)
            w, b = fold_bn(w, b, gamma, beta, mean, var)
        params.append((w, b))
    return params


def pointnet_ref(x, params):
    """Pure-JAX reference mirroring the kernel's precision scheme (bf16 MXU ops, f32 acc)."""
    (w1, b1), (w2, b2), (w3, b3), (w4, b4), (w5, b5), (w6, b6) = params
    xt = jnp.transpose(x, (0, 2, 1)).astype(jnp.float32)            # (B, 3, N)
    # layer 1 in f32, elementwise (matches the kernel's VPU FMAs)
    h = (w1[None, :, 0:1] * xt[:, 0:1, :]
         + w1[None, :, 1:2] * xt[:, 1:2, :]
         + w1[None, :, 2:3] * xt[:, 2:3, :]
         + b1[None, :, None])
    h = jax.nn.relu(h)
    # layers 2-4: bf16 operands, f32 accumulation
    for w, b in [(w2, b2), (w3, b3), (w4, b4)]:
        y = jnp.einsum("oc,bcn->bon", w.astype(jnp.bfloat16), h.astype(jnp.bfloat16),
                       preferred_element_type=jnp.float32)
        h = jax.nn.relu(y + b[None, :, None])
    g = jnp.max(h, axis=2)                                          # (B, 200) global max over points
    # head: bf16 operands, f32 accumulation
    h = jax.nn.relu(jnp.einsum("oc,bc->bo", w5.astype(jnp.bfloat16), g.astype(jnp.bfloat16),
                               preferred_element_type=jnp.float32) + b5[None, :])
    logits = jax.nn.relu(jnp.einsum("oc,bc->bo", w6.astype(jnp.bfloat16), h.astype(jnp.bfloat16),
                                    preferred_element_type=jnp.float32) + b6[None, :])
    return jax.nn.log_softmax(logits, axis=1)


if __name__ == "__main__":
    key = jax.random.PRNGKey(0)
    k_x, k_p = jax.random.split(key)

    # Small stand-in shapes: N plays the role of the 1000-point pool window.
    B, N, class_num = 4, 64, 10
    x = jax.random.normal(k_x, (B, N, 3), jnp.float32)
    params = make_params(k_p, class_num)

    out = pointnet_forward(x, params)
    out = jax.block_until_ready(out)

    ref = pointnet_ref(x, params)
    assert out.shape == (B, class_num)
    assert bool(jnp.all(jnp.isfinite(out)))
    assert jnp.allclose(out, ref, atol=5e-3, rtol=5e-3), "mismatch vs reference"

    print("KERNEL_OK")
</pallas_src>

<mosaic_0001>
module attributes {stable_mosaic.version = 11 : i64} {
  func.func @pointnet_kernel(%arg0: i32, %arg1: memref<1x3x256xf32, #tpu.memory_space<vmem>>, %arg2: memref<1x256xf32, #tpu.memory_space<vmem>>, %arg3: memref<64x3xf32, #tpu.memory_space<vmem>>, %arg4: memref<64x1xf32, #tpu.memory_space<vmem>>, %arg5: memref<64x64xbf16, #tpu.memory_space<vmem>>, %arg6: memref<64x1xf32, #tpu.memory_space<vmem>>, %arg7: memref<128x64xbf16, #tpu.memory_space<vmem>>, %arg8: memref<128x1xf32, #tpu.memory_space<vmem>>, %arg9: memref<256x128xbf16, #tpu.memory_space<vmem>>, %arg10: memref<256x1xf32, #tpu.memory_space<vmem>>, %arg11: memref<128x256xbf16, #tpu.memory_space<vmem>>, %arg12: memref<128x1xf32, #tpu.memory_space<vmem>>, %arg13: memref<10x128xbf16, #tpu.memory_space<vmem>>, %arg14: memref<10x1xf32, #tpu.memory_space<vmem>>, %arg15: memref<1x10x2xf32, #tpu.memory_space<vmem>>) attributes {dimension_semantics = [#tpu.dimension_semantics<parallel>], iteration_bounds = array<i64: 2>, scalar_prefetch = 0 : i64, scratch_operands = 0 : i64, tpu.core_type = #tpu.core_type<tc>, window_params = [{transform_indices = @transform_0, window_bounds = array<i64: 1, 3, 256>}, {pipeline_mode = #tpu.pipeline_mode<synchronous>, transform_indices = @transform_1, window_bounds = array<i64: 1, 256>}, {pipeline_mode = #tpu.pipeline_mode<synchronous>, transform_indices = @transform_2, window_bounds = array<i64: 64, 3>}, {pipeline_mode = #tpu.pipeline_mode<synchronous>, transform_indices = @transform_3, window_bounds = array<i64: 64, 1>}, {pipeline_mode = #tpu.pipeline_mode<synchronous>, transform_indices = @transform_4, window_bounds = array<i64: 64, 64>}, {pipeline_mode = #tpu.pipeline_mode<synchronous>, transform_indices = @transform_5, window_bounds = array<i64: 64, 1>}, {pipeline_mode = #tpu.pipeline_mode<synchronous>, transform_indices = @transform_6, window_bounds = array<i64: 128, 64>}, {pipeline_mode = #tpu.pipeline_mode<synchronous>, transform_indices = @transform_7, window_bounds = array<i64: 128, 1>}, {pipeline_mode = #tpu.pipeline_mode<synchronous>, transform_indices = @transform_8, window_bounds = array<i64: 256, 128>}, {pipeline_mode = #tpu.pipeline_mode<synchronous>, transform_indices = @transform_9, window_bounds = array<i64: 256, 1>}, {pipeline_mode = #tpu.pipeline_mode<synchronous>, transform_indices = @transform_10, window_bounds = array<i64: 128, 256>}, {pipeline_mode = #tpu.pipeline_mode<synchronous>, transform_indices = @transform_11, window_bounds = array<i64: 128, 1>}, {pipeline_mode = #tpu.pipeline_mode<synchronous>, transform_indices = @transform_12, window_bounds = array<i64: 10, 128>}, {pipeline_mode = #tpu.pipeline_mode<synchronous>, transform_indices = @transform_13, window_bounds = array<i64: 10, 1>}, {transform_indices = @transform_14, window_bounds = array<i64: 1, 10, 2>}]} {
    %c0 = arith.constant 0 : index
    %c0_0 = arith.constant 0 : index
    %c0_1 = arith.constant 0 : index
    %0 = vector.load %arg1[%c0, %c0_0, %c0_1] : memref<1x3x256xf32, #tpu.memory_space<vmem>>, vector<1x3x256xf32>
    %1 = vector.shape_cast %0 : vector<1x3x256xf32> to vector<3x256xf32>
    %c0_2 = arith.constant 0 : index
    %c0_3 = arith.constant 0 : index
    %2 = vector.load %arg3[%c0_2, %c0_3] : memref<64x3xf32, #tpu.memory_space<vmem>>, vector<64x3xf32>
    %3 = vector.extract_strided_slice %2 {offsets = [0, 0], sizes = [64, 1], strides = [1, 1]} : vector<64x3xf32> to vector<64x1xf32>
    %4 = vector.extract_strided_slice %1 {offsets = [0, 0], sizes = [1, 256], strides = [1, 1]} : vector<3x256xf32> to vector<1x256xf32>
    %5 = vector.broadcast %3 : vector<64x1xf32> to vector<64x256xf32>
    %6 = vector.broadcast %4 : vector<1x256xf32> to vector<64x256xf32>
    %7 = arith.mulf %5, %6 : vector<64x256xf32>
    %8 = vector.extract_strided_slice %2 {offsets = [0, 1], sizes = [64, 1], strides = [1, 1]} : vector<64x3xf32> to vector<64x1xf32>
    %9 = vector.extract_strided_slice %1 {offsets = [1, 0], sizes = [1, 256], strides = [1, 1]} : vector<3x256xf32> to vector<1x256xf32>
    %10 = vector.broadcast %8 : vector<64x1xf32> to vector<64x256xf32>
    %11 = vector.broadcast %9 : vector<1x256xf32> to vector<64x256xf32>
    %12 = arith.mulf %10, %11 : vector<64x256xf32>
    %13 = arith.addf %7, %12 : vector<64x256xf32>
    %14 = vector.extract_strided_slice %2 {offsets = [0, 2], sizes = [64, 1], strides = [1, 1]} : vector<64x3xf32> to vector<64x1xf32>
    %15 = vector.extract_strided_slice %1 {offsets = [2, 0], sizes = [1, 256], strides = [1, 1]} : vector<3x256xf32> to vector<1x256xf32>
    %16 = vector.broadcast %14 : vector<64x1xf32> to vector<64x256xf32>
    %17 = vector.broadcast %15 : vector<1x256xf32> to vector<64x256xf32>
    %18 = arith.mulf %16, %17 : vector<64x256xf32>
    %19 = arith.addf %13, %18 : vector<64x256xf32>
    %c0_4 = arith.constant 0 : index
    %c0_5 = arith.constant 0 : index
    %20 = vector.load %arg4[%c0_4, %c0_5] : memref<64x1xf32, #tpu.memory_space<vmem>>, vector<64x1xf32>
    %21 = vector.broadcast %20 : vector<64x1xf32> to vector<64x256xf32>
    %22 = arith.addf %19, %21 : vector<64x256xf32>
    %cst = arith.constant 0.000000e+00 : f32
    %23 = vector.broadcast %cst : f32 to vector<64x256xf32>
    %24 = arith.maximumf %22, %23 : vector<64x256xf32>
    %25 = arith.truncf %24 : vector<64x256xf32> to vector<64x256xbf16>
    %c0_6 = arith.constant 0 : index
    %c0_7 = arith.constant 0 : index
    %26 = vector.load %arg5[%c0_6, %c0_7] : memref<64x64xbf16, #tpu.memory_space<vmem>>, vector<64x64xbf16>
    %cst_8 = arith.constant dense<0.000000e+00> : vector<64x256xf32>
    %27 = tpu.matmul %26, %25, %cst_8 {dimension_numbers = #tpu.dot_dimension_numbers<[1], [0], [0], [1], [0, 0, 1, 1], [], []>} : vector<64x64xbf16>, vector<64x256xbf16>, vector<64x256xf32> -> vector<64x256xf32>
    %c0_9 = arith.constant 0 : index
    %c0_10 = arith.constant 0 : index
    %28 = vector.load %arg6[%c0_9, %c0_10] : memref<64x1xf32, #tpu.memory_space<vmem>>, vector<64x1xf32>
    %29 = vector.broadcast %28 : vector<64x1xf32> to vector<64x256xf32>
    %30 = arith.addf %27, %29 : vector<64x256xf32>
    %cst_11 = arith.constant 0.000000e+00 : f32
    %31 = vector.broadcast %cst_11 : f32 to vector<64x256xf32>
    %32 = arith.maximumf %30, %31 : vector<64x256xf32>
    %33 = arith.truncf %32 : vector<64x256xf32> to vector<64x256xbf16>
    %c0_12 = arith.constant 0 : index
    %c0_13 = arith.constant 0 : index
    %34 = vector.load %arg7[%c0_12, %c0_13] : memref<128x64xbf16, #tpu.memory_space<vmem>>, vector<128x64xbf16>
    %cst_14 = arith.constant dense<0.000000e+00> : vector<128x256xf32>
    %35 = tpu.matmul %34, %33, %cst_14 {dimension_numbers = #tpu.dot_dimension_numbers<[1], [0], [0], [1], [0, 0, 1, 1], [], []>} : vector<128x64xbf16>, vector<64x256xbf16>, vector<128x256xf32> -> vector<128x256xf32>
    %c0_15 = arith.constant 0 : index
    %c0_16 = arith.constant 0 : index
    %36 = vector.load %arg8[%c0_15, %c0_16] : memref<128x1xf32, #tpu.memory_space<vmem>>, vector<128x1xf32>
    %37 = vector.broadcast %36 : vector<128x1xf32> to vector<128x256xf32>
    %38 = arith.addf %35, %37 : vector<128x256xf32>
    %cst_17 = arith.constant 0.000000e+00 : f32
    %39 = vector.broadcast %cst_17 : f32 to vector<128x256xf32>
    %40 = arith.maximumf %38, %39 : vector<128x256xf32>
    %41 = arith.truncf %40 : vector<128x256xf32> to vector<128x256xbf16>
    %c0_18 = arith.constant 0 : index
    %c0_19 = arith.constant 0 : index
    %42 = vector.load %arg9[%c0_18, %c0_19] : memref<256x128xbf16, #tpu.memory_space<vmem>>, vector<256x128xbf16>
    %cst_20 = arith.constant dense<0.000000e+00> : vector<256x256xf32>
    %43 = tpu.matmul %42, %41, %cst_20 {dimension_numbers = #tpu.dot_dimension_numbers<[1], [0], [0], [1], [0, 0, 1, 1], [], []>} : vector<256x128xbf16>, vector<128x256xbf16>, vector<256x256xf32> -> vector<256x256xf32>
    %c0_21 = arith.constant 0 : index
    %c0_22 = arith.constant 0 : index
    %44 = vector.load %arg10[%c0_21, %c0_22] : memref<256x1xf32, #tpu.memory_space<vmem>>, vector<256x1xf32>
    %45 = vector.broadcast %44 : vector<256x1xf32> to vector<256x256xf32>
    %46 = arith.addf %43, %45 : vector<256x256xf32>
    %cst_23 = arith.constant 0.000000e+00 : f32
    %47 = vector.broadcast %cst_23 : f32 to vector<256x256xf32>
    %48 = arith.maximumf %46, %47 : vector<256x256xf32>
    %c0_24 = arith.constant 0 : index
    %c0_25 = arith.constant 0 : index
    %49 = vector.load %arg2[%c0_24, %c0_25] : memref<1x256xf32, #tpu.memory_space<vmem>>, vector<1x256xf32>
    %50 = vector.broadcast %49 : vector<1x256xf32> to vector<256x256xf32>
    %51 = arith.mulf %48, %50 : vector<256x256xf32>
    %52 = tpu.iota {dimensions = array<i32: 1>} : vector<1x2xi32>
    %53 = vector.extract_strided_slice %51 {offsets = [0, 0], sizes = [256, 128], strides = [1, 1]} : vector<256x256xf32> to vector<256x128xf32>
    %cst_26 = arith.constant dense<0xFF800000> : vector<256xf32>
    %54 = vector.multi_reduction <maximumf>, %53, %cst_26 [1] : vector<256x128xf32> to vector<256xf32>
    %55 = vector.shape_cast %54 : vector<256xf32> to vector<256x1xf32>
    %c0_i32 = arith.constant 0 : i32
    %56 = vector.broadcast %c0_i32 : i32 to vector<1x2xi32>
    %57 = arith.cmpi eq, %52, %56 : vector<1x2xi32>
    %58 = arith.extui %57 : vector<1x2xi1> to vector<1x2xi32>
    %59 = arith.sitofp %58 : vector<1x2xi32> to vector<1x2xf32>
    %60 = vector.broadcast %55 : vector<256x1xf32> to vector<256x2xf32>
    %61 = vector.broadcast %59 : vector<1x2xf32> to vector<256x2xf32>
    %62 = arith.mulf %60, %61 : vector<256x2xf32>
    %63 = vector.extract_strided_slice %51 {offsets = [0, 128], sizes = [256, 128], strides = [1, 1]} : vector<256x256xf32> to vector<256x128xf32>
    %cst_27 = arith.constant dense<0xFF800000> : vector<256xf32>
    %64 = vector.multi_reduction <maximumf>, %63, %cst_27 [1] : vector<256x128xf32> to vector<256xf32>
    %65 = vector.shape_cast %64 : vector<256xf32> to vector<256x1xf32>
    %c1_i32 = arith.constant 1 : i32
    %66 = vector.broadcast %c1_i32 : i32 to vector<1x2xi32>
    %67 = arith.cmpi eq, %52, %66 : vector<1x2xi32>
    %68 = arith.extui %67 : vector<1x2xi1> to vector<1x2xi32>
    %69 = arith.sitofp %68 : vector<1x2xi32> to vector<1x2xf32>
    %70 = vector.broadcast %65 : vector<256x1xf32> to vector<256x2xf32>
    %71 = vector.broadcast %69 : vector<1x2xf32> to vector<256x2xf32>
    %72 = arith.mulf %70, %71 : vector<256x2xf32>
    %73 = arith.addf %62, %72 : vector<256x2xf32>
    %74 = arith.truncf %73 : vector<256x2xf32> to vector<256x2xbf16>
    %c0_28 = arith.constant 0 : index
    %c0_29 = arith.constant 0 : index
    %75 = vector.load %arg11[%c0_28, %c0_29] : memref<128x256xbf16, #tpu.memory_space<vmem>>, vector<128x256xbf16>
    %cst_30 = arith.constant dense<0.000000e+00> : vector<128x2xf32>
    %76 = tpu.matmul %75, %74, %cst_30 {dimension_numbers = #tpu.dot_dimension_numbers<[1], [0], [0], [1], [0, 0, 1, 1], [], []>} : vector<128x256xbf16>, vector<256x2xbf16>, vector<128x2xf32> -> vector<128x2xf32>
    %c0_31 = arith.constant 0 : index
    %c0_32 = arith.constant 0 : index
    %77 = vector.load %arg12[%c0_31, %c0_32] : memref<128x1xf32, #tpu.memory_space<vmem>>, vector<128x1xf32>
    %78 = vector.broadcast %77 : vector<128x1xf32> to vector<128x2xf32>
    %79 = arith.addf %76, %78 : vector<128x2xf32>
    %cst_33 = arith.constant 0.000000e+00 : f32
    %80 = vector.broadcast %cst_33 : f32 to vector<128x2xf32>
    %81 = arith.maximumf %79, %80 : vector<128x2xf32>
    %82 = arith.truncf %81 : vector<128x2xf32> to vector<128x2xbf16>
    %c0_34 = arith.constant 0 : index
    %c0_35 = arith.constant 0 : index
    %83 = vector.load %arg13[%c0_34, %c0_35] : memref<10x128xbf16, #tpu.memory_space<vmem>>, vector<10x128xbf16>
    %cst_36 = arith.constant dense<0.000000e+00> : vector<10x2xf32>
    %84 = tpu.matmul %83, %82, %cst_36 {dimension_numbers = #tpu.dot_dimension_numbers<[1], [0], [0], [1], [0, 0, 1, 1], [], []>} : vector<10x128xbf16>, vector<128x2xbf16>, vector<10x2xf32> -> vector<10x2xf32>
    %c0_37 = arith.constant 0 : index
    %c0_38 = arith.constant 0 : index
    %85 = vector.load %arg14[%c0_37, %c0_38] : memref<10x1xf32, #tpu.memory_space<vmem>>, vector<10x1xf32>
    %86 = vector.broadcast %85 : vector<10x1xf32> to vector<10x2xf32>
    %87 = arith.addf %84, %86 : vector<10x2xf32>
    %cst_39 = arith.constant 0.000000e+00 : f32
    %88 = vector.broadcast %cst_39 : f32 to vector<10x2xf32>
    %89 = arith.maximumf %87, %88 : vector<10x2xf32>
    %cst_40 = arith.constant dense<0xFF800000> : vector<2xf32>
    %90 = vector.multi_reduction <maximumf>, %89, %cst_40 [0] : vector<10x2xf32> to vector<2xf32>
    %91 = vector.shape_cast %90 : vector<2xf32> to vector<1x2xf32>
    %92 = vector.broadcast %91 : vector<1x2xf32> to vector<10x2xf32>
    %93 = arith.subf %89, %92 : vector<10x2xf32>
    %94 = math.exp %93 : vector<10x2xf32>
    %cst_41 = arith.constant dense<0.000000e+00> : vector<2xf32>
    %95 = vector.multi_reduction <add>, %94, %cst_41 [0] : vector<10x2xf32> to vector<2xf32>
    %96 = vector.shape_cast %95 : vector<2xf32> to vector<1x2xf32>
    %97 = math.log %96 : vector<1x2xf32>
    %98 = vector.broadcast %97 : vector<1x2xf32> to vector<10x2xf32>
    %99 = arith.subf %93, %98 : vector<10x2xf32>
    %c0_42 = arith.constant 0 : index
    %c0_43 = arith.constant 0 : index
    %c0_44 = arith.constant 0 : index
    %100 = vector.load %arg15[%c0_42, %c0_43, %c0_44] : memref<1x10x2xf32, #tpu.memory_space<vmem>>, vector<1x10x2xf32>
    %101 = vector.shape_cast %100 : vector<1x10x2xf32> to vector<10x2xf32>
    %102 = vector.shape_cast %99 : vector<10x2xf32> to vector<1x10x2xf32>
    tpu.vector_store %arg15[%c0_42, %c0_43, %c0_44], %102 {strides = array<i32>} : memref<1x10x2xf32, #tpu.memory_space<vmem>>, vector<1x10x2xf32>,
    return
  }
  func.func @transform_0(%arg0: i32) -> (i32, i32, i32) {
    %c0_i32 = arith.constant 0 : i32
    %c0_i32_0 = arith.constant 0 : i32
    %c0_i32_1 = arith.constant 0 : i32
    return %arg0, %c0_i32, %c0_i32_0 : i32, i32, i32
  }
  func.func @transform_1(%arg0: i32) -> (i32, i32) {
    %c0_i32 = arith.constant 0 : i32
    %c0_i32_0 = arith.constant 0 : i32
    %c0_i32_1 = arith.constant 0 : i32
    return %c0_i32, %c0_i32_0 : i32, i32
  }
  func.func @transform_2(%arg0: i32) -> (i32, i32) {
    %c0_i32 = arith.constant 0 : i32
    %c0_i32_0 = arith.constant 0 : i32
    %c0_i32_1 = arith.constant 0 : i32
    return %c0_i32, %c0_i32_0 : i32, i32
  }
  func.func @transform_3(%arg0: i32) -> (i32, i32) {
    %c0_i32 = arith.constant 0 : i32
    %c0_i32_0 = arith.constant 0 : i32
    %c0_i32_1 = arith.constant 0 : i32
    return %c0_i32, %c0_i32_0 : i32, i32
  }
  func.func @transform_4(%arg0: i32) -> (i32, i32) {
    %c0_i32 = arith.constant 0 : i32
    %c0_i32_0 = arith.constant 0 : i32
    %c0_i32_1 = arith.constant 0 : i32
    return %c0_i32, %c0_i32_0 : i32, i32
  }
  func.func @transform_5(%arg0: i32) -> (i32, i32) {
    %c0_i32 = arith.constant 0 : i32
    %c0_i32_0 = arith.constant 0 : i32
    %c0_i32_1 = arith.constant 0 : i32
    return %c0_i32, %c0_i32_0 : i32, i32
  }
  func.func @transform_6(%arg0: i32) -> (i32, i32) {
    %c0_i32 = arith.constant 0 : i32
    %c0_i32_0 = arith.constant 0 : i32
    %c0_i32_1 = arith.constant 0 : i32
    return %c0_i32, %c0_i32_0 : i32, i32
  }
  func.func @transform_7(%arg0: i32) -> (i32, i32) {
    %c0_i32 = arith.constant 0 : i32
    %c0_i32_0 = arith.constant 0 : i32
    %c0_i32_1 = arith.constant 0 : i32
    return %c0_i32, %c0_i32_0 : i32, i32
  }
  func.func @transform_8(%arg0: i32) -> (i32, i32) {
    %c0_i32 = arith.constant 0 : i32
    %c0_i32_0 = arith.constant 0 : i32
    %c0_i32_1 = arith.constant 0 : i32
    return %c0_i32, %c0_i32_0 : i32, i32
  }
  func.func @transform_9(%arg0: i32) -> (i32, i32) {
    %c0_i32 = arith.constant 0 : i32
    %c0_i32_0 = arith.constant 0 : i32
    %c0_i32_1 = arith.constant 0 : i32
    return %c0_i32, %c0_i32_0 : i32, i32
  }
  func.func @transform_10(%arg0: i32) -> (i32, i32) {
    %c0_i32 = arith.constant 0 : i32
    %c0_i32_0 = arith.constant 0 : i32
    %c0_i32_1 = arith.constant 0 : i32
    return %c0_i32, %c0_i32_0 : i32, i32
  }
  func.func @transform_11(%arg0: i32) -> (i32, i32) {
    %c0_i32 = arith.constant 0 : i32
    %c0_i32_0 = arith.constant 0 : i32
    %c0_i32_1 = arith.constant 0 : i32
    return %c0_i32, %c0_i32_0 : i32, i32
  }
  func.func @transform_12(%arg0: i32) -> (i32, i32) {
    %c0_i32 = arith.constant 0 : i32
    %c0_i32_0 = arith.constant 0 : i32
    %c0_i32_1 = arith.constant 0 : i32
    return %c0_i32, %c0_i32_0 : i32, i32
  }
  func.func @transform_13(%arg0: i32) -> (i32, i32) {
    %c0_i32 = arith.constant 0 : i32
    %c0_i32_0 = arith.constant 0 : i32
    %c0_i32_1 = arith.constant 0 : i32
    return %c0_i32, %c0_i32_0 : i32, i32
  }
  func.func @transform_14(%arg0: i32) -> (i32, i32, i32) {
    %c0_i32 = arith.constant 0 : i32
    %c0_i32_0 = arith.constant 0 : i32
    %c0_i32_1 = arith.constant 0 : i32
    return %arg0, %c0_i32, %c0_i32_0 : i32, i32, i32
  }
}

</mosaic_0001>

<bundles_post_ra>
// kernel: tpu_custom_call.1
= control target key start
LH: loop header
LB: loop body
LE: loop exit
PB: predicated region body
PF: predicated region fallthrough
CT: control target
= control target key end

     0   :  { %s3032_s29 = smov 0   ;;  %s3942_s0 = inlined_call_operand.vmem [shape: f32[2,3,256], index: 0, kind: input, shape index: {}]   ;;  %s3943_s1 = inlined_call_operand.vmem [shape: f32[1,256], index: 1, kind: input, shape index: {}]   ;;  %s3944_s2 = inlined_call_operand.vmem [shape: f32[64,3], index: 2, kind: input, shape index: {}]   ;;  %s3945_s3 = inlined_call_operand.vmem [shape: f32[64,1], index: 3, kind: input, shape index: {}]   ;;  %s3946_s4 = inlined_call_operand.vmem [shape: bf16[64,64], index: 4, kind: input, shape index: {}]   ;;  %s3947_s5 = inlined_call_operand.vmem [shape: f32[64,1], index: 5, kind: input, shape index: {}]   ;;  %s3948_s6 = inlined_call_operand.vmem [shape: bf16[128,64], index: 6, kind: input, shape index: {}]   ;;  %s3949_s7 = inlined_call_operand.vmem [shape: f32[128,1], index: 7, kind: input, shape index: {}]   ;;  %s3950_s8 = inlined_call_operand.vmem [shape: bf16[256,128], index: 8, kind: input, shape index: {}]   ;;  %s3951_s9 = inlined_call_operand.vmem [shape: f32[256,1], index: 9, kind: input, shape index: {}]   ;;  %s3952_s10 = inlined_call_operand.vmem [shape: bf16[128,256], index: 10, kind: input, shape index: {}]   ;;  %s3953_s11 = inlined_call_operand.vmem [shape: f32[128,1], index: 11, kind: input, shape index: {}]   ;;  %s3954_s12 = inlined_call_operand.vmem [shape: bf16[10,128], index: 12, kind: input, shape index: {}]   ;;  %s3955_s13 = inlined_call_operand.vmem [shape: f32[10,1], index: 13, kind: input, shape index: {}]   ;;  %s3956_s14 = inlined_call_operand.vmem [shape: f32[2,10,2], index: 14, kind: output, shape index: {}]  }
   0x1 LB: > { %s2692_s30 = sadd.s32 4294967295, %s2950_s29   ;;  %p2696_p0 = scmp.ge.s32.totalorder %s2950_s29, 1  ;;  %s2950_s29 = sphi %s3032_s29, %s24_s29  }
   0x2   : > { %p412_p1 = scmp.lt.s32.totalorder %s2950_s29, 3 }
   0x4   : > { %p413_p2 = pnand %p2696_p0, %p412_p1 }
   0x5   : > { %v470_v0 = vld [vmem:[%s3944_s2] sm:$0xff] (!%p413_p2)  ;;  %v2952_v1 = vmov (!%p413_p2), 2   ;;  %v2953_v2 = vmov (!%p413_p2), 1   ;;  %v472_v3 = vld [vmem:[%s3944_s2 + $0x10] sm:$0xff] (!%p413_p2)  ;;  %v471_v4 = vld [vmem:[%s3944_s2 + $0x8] sm:$0xff] (!%p413_p2)  ;;  %v2954_v5 = vmov (!%p413_p2), 0   ;;  %v519_v57 = vlaneseq (!%p413_p2) }
   0x6   : > { %416 = sbr.rel (%p413_p2) target bundleno = 1824 (0x720), region = 76  ;;  %2871 = vset.pattern.permute.xlu0 (!%p413_p2), %v2952_v1  ;;  %2870 = vset.pattern.permute.xlu1 (!%p413_p2), %v2953_v2  ;;  %v475_v6 = vld [vmem:[%s3944_s2 + $0x28] sm:$0xff] (!%p413_p2)  ;;  %v474_v7 = vld [vmem:[%s3944_s2 + $0x20] sm:$0xff] (!%p413_p2)  ;;  %v477_v8 = vld [vmem:[%s3944_s2 + $0x38] sm:$0xff] (!%p413_p2)  ;;  %p458_p3 = scmp.lt.s32.totalorder (!%p413_p2), %s2692_s30, 1  ;;  %vm881_vm0 = vcmask (!%p413_p2), 523264  }
   0x7   : > { %636 = vperm.xlu0 (!%p413_p2), %2871, %v470_v0   ;;  %554 = vperm.xlu1 (!%p413_p2), %2870, %v470_v0   ;;  %v473_v9 = vld [vmem:[%s3944_s2 + $0x18] sm:$0xff] (!%p413_p2)  ;;  %v717_v10 = vld [vmem:[%s3945_s3] sm:$0xff] (!%p413_p2)  ;;  %v718_v11 = vld [vmem:[%s3945_s3 + $0x8] sm:$0xff] (!%p413_p2)  ;;  %v520_v62 = vshrl.u32 (!%p413_p2), %v519_v57, 7  ;;  %vm2956_vm3 = vmmov (!%p413_p2), 0   ;;  %vm2605_vm4 = vcmask (!%p413_p2), 15360  }
   0x8   : > { %926 = vmatprep.mubr.bf16.mxu0 (!%p413_p2), %v2954_v5  ;;  %1199 = vmatprep.mubr.bf16.mxu1 (!%p413_p2), %v2954_v5  ;;  %v476_v12 = vld [vmem:[%s3944_s2 + $0x30] sm:$0xff] (!%p413_p2)  ;;  %v721_v13 = vld [vmem:[%s3945_s3 + $0x20] sm:$0xff] (!%p413_p2)  ;;  %v724_v14 = vld [vmem:[%s3945_s3 + $0x38] sm:$0xff] (!%p413_p2)  ;;  %vm2607_vm5 = vcmask (!%p413_p2), 9216  }
   0x9   : > { %v814_v15 = vld [vmem:[%s3947_s5 + $0x8] sm:$0xff] (!%p413_p2)  ;;  %v816_v16 = vld [vmem:[%s3947_s5 + $0x18] sm:$0xff] (!%p413_p2)  ;;  %v719_v17 = vld [vmem:[%s3945_s3 + $0x10] sm:$0xff] (!%p413_p2) }
   0xa   : > { %v818_v18 = vld [vmem:[%s3947_s5 + $0x28] sm:$0xff] (!%p413_p2)  ;;  %v720_v19 = vld [vmem:[%s3945_s3 + $0x18] sm:$0xff] (!%p413_p2)  ;;  %v723_v28 = vld [vmem:[%s3945_s3 + $0x30] sm:$0xff] (!%p413_p2) }
   0xb   : > { %644 = vperm.xlu0 (!%p413_p2), %2871, %v472_v3   ;;  %558 = vperm.xlu1 (!%p413_p2), %2870, %v471_v4   ;;  %v820_v20 = vld [vmem:[%s3947_s5 + $0x38] sm:$0xff] (!%p413_p2)  ;;  %v1008_v21 = vld [vmem:[%s3949_s7 + $0x8] sm:$0xff] (!%p413_p2)  ;;  %v813_v30 = vld [vmem:[%s3947_s5] sm:$0xff] (!%p413_p2) }
   0xc   : > { %v1010_v22 = vld [vmem:[%s3949_s7 + $0x18] sm:$0xff] (!%p413_p2)  ;;  %v1012_v23 = vld [vmem:[%s3949_s7 + $0x28] sm:$0xff] (!%p413_p2)  ;;  %v815_v32 = vld [vmem:[%s3947_s5 + $0x10] sm:$0xff] (!%p413_p2) }
   0xd   : > { %v1014_v24 = vld [vmem:[%s3949_s7 + $0x38] sm:$0xff]  ;;  %v1016_v25 = vld [vmem:[%s3949_s7 + $0x48] sm:$0xff]  ;;  %v817_v34 = vld [vmem:[%s3947_s5 + $0x20] sm:$0xff]  ;;  %s3958_s30 = smov (!%p458_p3, %s2692_s30), 1 }
   0xe   : > { %v722_v26 = vld [vmem:[%s3945_s3 + $0x28] sm:$0xff]  ;;  %v1018_v27 = vld [vmem:[%s3949_s7 + $0x58] sm:$0xff]  ;;  %v819_v36 = vld [vmem:[%s3947_s5 + $0x30] sm:$0xff]  ;;  %s2762_s19 = sshll.u32 %s3958_s30, 3  ;;  %s2763_s25 = sshll.u32 %s3958_s30, 4 }
   0xf   : > { %656 = vperm.xlu0 %2871, %v475_v6   ;;  %2872 = vset.pattern.permute.xlu1 %v2952_v1  ;;  %v1020_v29 = vld [vmem:[%s3949_s7 + $0x68] sm:$0xff]  ;;  %v1022_v31 = vld [vmem:[%s3949_s7 + $0x78] sm:$0xff]  ;;  %v1007_v38 = vld [vmem:[%s3949_s7] sm:$0xff]  ;;  %s462_s24 = scalar_lea.vmem %s3942_s0, %s2762_s19  ;;  %s467_s28 = scalar_lea.vmem %s3956_s14, %s2763_s25 }
  0x10   : > { %640 = vperm.xlu1 %2872, %v471_v4   ;;  %v1377_v33 = vld [vmem:[%s3951_s9 + $0x88] sm:$0xff]  ;;  %v1379_v37 = vld [vmem:[%s3951_s9 + $0x98] sm:$0xff]  ;;  %v1009_v40 = vld [vmem:[%s3949_s7 + $0x10] sm:$0xff] }
  0x11   : > { %v1361_v35 = vld [vmem:[%s3951_s9 + $0x8] sm:$0xff]  ;;  %v1363_v39 = vld [vmem:[%s3951_s9 + $0x18] sm:$0xff]  ;;  %v1011_v42 = vld [vmem:[%s3949_s7 + $0x20] sm:$0xff] }
  0x12   : > { %v1381_v41 = vld [vmem:[%s3951_s9 + $0xa8] sm:$0xff]  ;;  %v1013_v44 = vld [vmem:[%s3949_s7 + $0x30] sm:$0xff]  ;;  %v1383_v45 = vld [vmem:[%s3951_s9 + $0xb8] sm:$0xff] }
  0x13   : > { %2879 = vset.pattern.permute.xlu0 %v2953_v2  ;;  %v1365_v43 = vld [vmem:[%s3951_s9 + $0x28] sm:$0xff]  ;;  %v1015_v46 = vld [vmem:[%s3949_s7 + $0x40] sm:$0xff]  ;;  %v1367_v47 = vld [vmem:[%s3951_s9 + $0x38] sm:$0xff] }
  0x14   : > { %570 = vperm.xlu0 %2879, %v474_v7   ;;  %2873 = vset.pattern.permute.xlu1 %v2954_v5  ;;  %v1017_v48 = vld [vmem:[%s3949_s7 + $0x50] sm:$0xff]  ;;  %v1385_v51 = vld [vmem:[%s3951_s9 + $0xc8] sm:$0xff]  ;;  %v1019_v52 = vld [vmem:[%s3949_s7 + $0x60] sm:$0xff] }
  0x15   : > { %490 = vperm.xlu1 %2873, %v472_v3   ;;  %v1369_v55 = vld [vmem:[%s3951_s9 + $0x48] sm:$0xff]  ;;  %v1021_v56 = vld [vmem:[%s3949_s7 + $0x70] sm:$0xff]  ;;  %v1387_v59 = vld [vmem:[%s3951_s9 + $0xd8] sm:$0xff] }
  0x16   : > { %v1376_v61 = vld [vmem:[%s3951_s9 + $0x80] sm:$0xff]  ;;  %v1371_v63 = vld [vmem:[%s3951_s9 + $0x58] sm:$0xff] }
  0x18   : > { %582 = vperm.xlu0 %2879, %v477_v8  }
  0x19   : > { %2874 = vset.pattern.permute.xlu1 %v2953_v2 }
  0x1a   : > { %562 = vperm.xlu1 %2874, %v472_v3   ;;  %v591_v3 = vsub.s32 5, %v520_v62 }
  0x1c   : > { %2882 = vset.pattern.permute.xlu0 %v2954_v5 }
  0x1d   : > { %480 = vperm.xlu0 %2882, %v470_v0  }
  0x1e   : > { %566 = vperm.xlu1 %2874, %v473_v9  }
  0x21   : > { %485 = vperm.xlu0 %2882, %v471_v4   ;;  %v3244_v4 = vsub.s32 0, %v520_v62 }
  0x22   : > { %2875 = vset.pattern.permute.xlu1 %v2952_v1 }
  0x23   : > { %648 = vperm.xlu1 %2875, %v473_v9  }
  0x25   : > { %495 = vperm.xlu0 %2882, %v473_v9   ;;  %v1389_v9 = vld [vmem:[%s3951_s9 + $0xe8] sm:$0xff] }
  0x27   : > { %2876 = vset.pattern.permute.xlu1 %v2954_v5 }
  0x28   : > { %727 = vperm.xlu1 %2876, %v717_v10   ;;  %v669_v10 = vsub.s32 2, %v520_v62 }
  0x29   : > { %732 = vperm.xlu0 %2882, %v718_v11   ;;  %v673_v11 = vsub.s32 6, %v520_v62 }
  0x2c   : > { %500 = vperm.xlu1 %2876, %v474_v7  }
  0x2d   : > { %510 = vperm.xlu0 %2882, %v476_v12  }
  0x30   : > { %505 = vperm.xlu1 %2876, %v475_v6  }
  0x31   : > { %747 = vperm.xlu0 %2882, %v721_v13   ;;  %v1378_v13 = vld [vmem:[%s3951_s9 + $0x90] sm:$0xff] }
  0x34   : > { %2877 = vset.pattern.permute.xlu1 %v2953_v2 }
  0x35   : > { %762 = vperm.xlu0 %2882, %v724_v14   ;;  %574 = vperm.xlu1 %2877, %v475_v6   ;;  %v525_v6 = vsub.s32 4, %v520_v62 }
  0x39   : > { %828 = vperm.xlu0 %2882, %v814_v15   ;;  %2878 = vset.pattern.permute.xlu1 %v2952_v1 }
  0x3a   : > { %652 = vperm.xlu1 %2878, %v474_v7  }
  0x3d   : > { %838 = vperm.xlu0 %2882, %v816_v16  }
  0x3e   : > { %2880 = vset.pattern.permute.xlu1 %v2954_v5 }
  0x3f   : > { %737 = vperm.xlu1 %2880, %v719_v17  }
  0x41   : > { %848 = vperm.xlu0 %2882, %v818_v18  }
  0x43   : > { %742 = vperm.xlu1 %2880, %v720_v19   ;;  %v1373_v19 = vld [vmem:[%s3951_s9 + $0x68] sm:$0xff] }
  0x45   : > { %858 = vperm.xlu0 %2882, %v820_v20  }
  0x47   : > { %515 = vperm.xlu1 %2880, %v477_v8  }
  0x49   : > { %1030 = vperm.xlu0 %2882, %v1008_v21  }
  0x4b   : > { %2881 = vset.pattern.permute.xlu1 %v2953_v2  ;;  %v3242_v2 = vsub.s32 1, %v520_v62  ;;  %v1382_v62 = vld [vmem:[%s3951_s9 + $0xb0] sm:$0xff] }
  0x4c   : > { %578 = vperm.xlu1 %2881, %v476_v12  }
  0x4d   : > { %1040 = vperm.xlu0 %2882, %v1010_v22   ;;  %v1362_v22 = vld [vmem:[%s3951_s9 + $0x10] sm:$0xff] }
  0x50   : > { %2883 = vset.pattern.permute.xlu1 %v2952_v1  ;;  %v1360_v1 = vld [vmem:[%s3951_s9] sm:$0xff] }
  0x51   : > { %1050 = vperm.xlu0 %2882, %v1012_v23   ;;  %660 = vperm.xlu1 %2883, %v476_v12  }
  0x55   : > { %1060 = vperm.xlu0 %2882, %v1014_v24   ;;  %664 = vperm.xlu1 %2883, %v477_v8   ;;  %v469_v8 = vld [vmem:[%s462_s24] sm:$0x77] }
  0x56   : > { %v588_v14 = vrot.slane %v469_v8, %v3242_v2  ;;  %v592_v15 = vrot.slane %v469_v8, %v591_v3  ;;  %v522_v16 = vrot.slane %v469_v8, %v3244_v4  ;;  %v526_v17 = vrot.slane %v469_v8, %v525_v6 }
  0x57   : > { %v670_v20 = vrot.slane %v469_v8, %v669_v10  ;;  %v674_v21 = vrot.slane %v469_v8, %v673_v11 }
  0x58   : > { %v3267_v23 = vrot.slane %v588_v14, %v3242_v2  ;;  %v3270_v24 = vrot.slane %v592_v15, %v3242_v2 }
  0x59   : > { %1070 = vperm.xlu0 %2882, %v1016_v25   ;;  %2884 = vset.pattern.permute.xlu1 %v2954_v5  ;;  %v3273_v25 = vrot.slane %v522_v16, %v3244_v4 }
  0x5a   : > { %752 = vperm.xlu1 %2884, %v722_v26   ;;  %v3276_v26 = vrot.slane %v526_v17, %v3244_v4 }
  0x5d   : > { %1080 = vperm.xlu0 %2882, %v1018_v27  }
  0x5e   : > { %757 = vperm.xlu1 %2884, %v723_v28  }
  0x61   : > { %1090 = vperm.xlu0 %2882, %v1020_v29  }
  0x62   : > { %823 = vperm.xlu1 %2884, %v813_v30  }
  0x65   : > { %1100 = vperm.xlu0 %2882, %v1022_v31   ;;  %v1391_v31 = vld [vmem:[%s3951_s9 + $0xf8] sm:$0xff] }
  0x66   : > { %833 = vperm.xlu1 %2884, %v815_v32   ;;  %v1380_v32 = vld [vmem:[%s3951_s9 + $0xa0] sm:$0xff] }
  0x69   : > { %1479 = vperm.xlu0 %2882, %v1377_v33  }
  0x6a   : > { %843 = vperm.xlu1 %2884, %v817_v34  }
  0x6d   : > { %1399 = vperm.xlu0 %2882, %v1361_v35   ;;  %v3292_v35 = vrot.slane %v670_v20, %v669_v10  ;;  %v1384_v20 = vld [vmem:[%s3951_s9 + $0xc0] sm:$0xff] }
  0x6e   : > { %853 = vperm.xlu1 %2884, %v819_v36   ;;  %v3294_v36 = vrot.slane %v674_v21, %v669_v10  ;;  %v1368_v21 = vld [vmem:[%s3951_s9 + $0x40] sm:$0xff] }
  0x71   : > { %1489 = vperm.xlu0 %2882, %v1379_v37  }
  0x72   : > { %1025 = vperm.xlu1 %2884, %v1007_v38  }
  0x75   : > { %1409 = vperm.xlu0 %2882, %v1363_v39  }
  0x76   : > { %1035 = vperm.xlu1 %2884, %v1009_v40  }
  0x79   : > { %1499 = vperm.xlu0 %2882, %v1381_v41  }
  0x7a   : > { %1045 = vperm.xlu1 %2884, %v1011_v42  }
  0x7d   : > { %1419 = vperm.xlu0 %2882, %v1365_v43  }
  0x7e   : > { %1055 = vperm.xlu1 %2884, %v1013_v44  }
  0x81   : > { %1509 = vperm.xlu0 %2882, %v1383_v45  }
  0x82   : > { %1065 = vperm.xlu1 %2884, %v1015_v46  }
  0x85   : > { %1429 = vperm.xlu0 %2882, %v1367_v47   ;;  %v1375_v47 = vld [vmem:[%s3951_s9 + $0x78] sm:$0xff] }
  0x86   : > { %1075 = vperm.xlu1 %2884, %v1017_v48   ;;  %v3195_v49 = vpop.permute.xlu1 %554  ;;  %v3197_v50 = vpop.permute.xlu0 %636 }
  0x87   : > { %v603_v33 = vmul.f32 %v3267_v23, %v3195_v49  ;;  %v604_v34 = vmul.f32 %v3270_v24, %v3195_v49  ;;  %v685_v42 = vmul.f32 %v3292_v35, %v3197_v50  ;;  %v686_v43 = vmul.f32 %v3294_v36, %v3197_v50 }
  0x89   : > { %1519 = vperm.xlu0 %2882, %v1385_v51   ;;  %v1364_v51 = vld [vmem:[%s3951_s9 + $0x20] sm:$0xff] }
  0x8a   : > { %1085 = vperm.xlu1 %2884, %v1019_v52   ;;  %v559_v53 = vpop.permute.xlu1 %558  ;;  %v3207_v54 = vpop.permute.xlu0 %644 }
  0x8b   : > { %v605_v38 = vmul.f32 %v3267_v23, %v559_v53  ;;  %v606_v39 = vmul.f32 %v3270_v24, %v559_v53 }
  0x8d   : > { %1439 = vperm.xlu0 %2882, %v1369_v55  }
  0x8e   : > { %1095 = vperm.xlu1 %2884, %v1021_v56   ;;  %v3219_v58 = vpop.permute.xlu0 %656 }
  0x8f   : > { %v3225_v60 = vpop.permute.xlu1 %640 }
  0x90   : > { %v687_v53 = vmul.f32 %v3292_v35, %v3225_v60  ;;  %v688_v50 = vmul.f32 %v3294_v36, %v3225_v60 }
  0x91   : > { %1529 = vperm.xlu0 %2882, %v1387_v59  }
  0x92   : > { %1474 = vperm.xlu1 %2884, %v1376_v61  }
  0x93   : > { %v3237_v0 = vpop.permute.xlu0 %570 }
  0x94   : > { %v3246_v7 = vpop.permute.xlu1 %490 }
  0x95   : > { %1449 = vperm.xlu0 %2882, %v1371_v63  }
  0x96   : > { %1394 = vperm.xlu1 %2884, %v1360_v1  }
  0x97   : > { %v3251_v12 = vpop.permute.xlu0 %582 }
  0x99   : > { %1539 = vperm.xlu0 %2882, %v1389_v9   ;;  %v3258_v18 = vpop.permute.xlu1 %562 }
  0x9a   : > { %1484 = vperm.xlu1 %2884, %v1378_v13   ;;  %v1366_v13 = vld [vmem:[%s3951_s9 + $0x30] sm:$0xff] }
  0x9c   : > { %v481_v27 = vpop.permute.xlu0 %480 }
  0x9d   : > { %1459 = vperm.xlu0 %2882, %v1373_v19   ;;  %v3278_v28 = vpop.permute.xlu1 %566  ;;  %v537_v29 = vmul.f32 %v3273_v25, %v481_v27  ;;  %v538_v30 = vmul.f32 %v3276_v26, %v481_v27  ;;  %v607_v27 = vmul.f32 %v3267_v23, %v3258_v18 }
  0x9e   : > { %1404 = vperm.xlu1 %2884, %v1362_v22  }
  0x9f   : > { %v619_v44 = vadd.f32 %v603_v33, %v537_v29  ;;  %v620_v45 = vadd.f32 %v604_v34, %v538_v30  ;;  %v608_v29 = vmul.f32 %v3270_v24, %v3258_v18  ;;  %v1386_v30 = vld [vmem:[%s3951_s9 + $0xd0] sm:$0xff]  ;;  %v690_v18 = vmul.f32 %v3294_v36, %v3207_v54 }
  0xa0   : > { %v486_v37 = vpop.permute.xlu0 %485 }
  0xa1   : > { %v539_v40 = vmul.f32 %v3273_v25, %v486_v37  ;;  %v540_v41 = vmul.f32 %v3276_v26, %v486_v37  ;;  %1549 = vperm.xlu0 %2882, %v1391_v31   ;;  %v701_v55 = vadd.f32 %v685_v42, %v619_v44  ;;  %v702_v56 = vadd.f32 %v686_v43, %v620_v45  ;;  %v1370_v42 = vld [vmem:[%s3951_s9 + $0x50] sm:$0xff] }
  0xa2   : > { %1494 = vperm.xlu1 %2884, %v1380_v32   ;;  %v649_v46 = vpop.permute.xlu1 %648  ;;  %v541_v31 = vmul.f32 %v3273_v25, %v3246_v7  ;;  %v542_v32 = vmul.f32 %v3276_v26, %v3246_v7  ;;  %v610_v7 = vmul.f32 %v3270_v24, %v3278_v28 }
  0xa3   : > { %v621_v48 = vadd.f32 %v605_v38, %v539_v40  ;;  %v622_v49 = vadd.f32 %v606_v39, %v540_v41  ;;  %v689_v38 = vmul.f32 %v3292_v35, %v3207_v54  ;;  %v609_v41 = vmul.f32 %v3267_v23, %v3278_v28 }
  0xa4   : > { %v496_v52 = vpop.permute.xlu0 %495  ;;  %v623_v39 = vadd.f32 %v607_v27, %v541_v31  ;;  %v624_v40 = vadd.f32 %v608_v29, %v542_v32  ;;  %v692_v54 = vmul.f32 %v3294_v36, %v649_v46 }
  0xa5   : > { %1469 = vperm.xlu0 %2882, %v1375_v47   ;;  %v703_v61 = vadd.f32 %v687_v53, %v621_v48  ;;  %v704_v63 = vadd.f32 %v688_v50, %v622_v49  ;;  %v543_v33 = vmul.f32 %v3273_v25, %v496_v52  ;;  %v544_v34 = vmul.f32 %v3276_v26, %v496_v52 }
  0xa6   : > { %1414 = vperm.xlu1 %2884, %v1364_v51   ;;  %v691_v47 = vmul.f32 %v3292_v35, %v649_v46  ;;  %v705_v48 = vadd.f32 %v689_v38, %v623_v39  ;;  %v706_v49 = vadd.f32 %v690_v18, %v624_v40  ;;  %v1388_v51 = vld [vmem:[%s3951_s9 + $0xe0] sm:$0xff]  ;;  %v696_v38 = vmul.f32 %v3294_v36, %v3219_v58 }
  0xa7   : > { %v728_v59 = vpop.permute.xlu1 %727  ;;  %v625_v43 = vadd.f32 %v609_v41, %v543_v33  ;;  %v626_v44 = vadd.f32 %v610_v7, %v544_v34  ;;  %v617_v39 = vmul.f32 %v3267_v23, %v3251_v12  ;;  %v618_v40 = vmul.f32 %v3270_v24, %v3251_v12 }
  0xa8   : > { %v765_v1 = vadd.f32 %v728_v59, %v701_v55  ;;  %v733_v3 = vpop.permute.xlu0 %732  ;;  %v766_v6 = vadd.f32 %v728_v59, %v702_v56 }
  0xa9   : > { %v767_v8 = vadd.f32 %v733_v3, %v703_v61  ;;  %v768_v9 = vadd.f32 %v733_v3, %v704_v63  ;;  %v707_v53 = vadd.f32 %v691_v47, %v625_v43  ;;  %v708_v50 = vadd.f32 %v692_v54, %v626_v44  ;;  %v1372_v61 = vld [vmem:[%s3951_s9 + $0x60] sm:$0xff] }
  0xaa   : > { %1504 = vperm.xlu1 %2884, %v1382_v62   ;;  %v782_v10 = vmax.f32 %v766_v6, 0.0  ;;  %v781_v11 = vmax.f32 %v765_v1, 0.0 }
  0xab   : > { %v3317_v60 = vpop.permute.xlu1 %500  ;;  %v784_v14 = vmax.f32 %v768_v9, 0.0  ;;  %v783_v15 = vmax.f32 %v767_v8, 0.0  ;;  %v1390_v8 = vld [vmem:[%s3951_s9 + $0xf0] sm:$0xff] }
  0xad   : > { %v798_v16 = vpack.c.bf16 %v784_v14, %v782_v10  ;;  %v797_v17 = vpack.c.bf16 %v783_v15, %v781_v11  ;;  %v1374_v11 = vld [vmem:[%s3951_s9 + $0x70] sm:$0xff]  ;;  %v612_v14 = vmul.f32 %v3270_v24, %v3237_v0  ;;  %v545_v15 = vmul.f32 %v3273_v25, %v3317_v60 }
  0xae   : > { %1424 = vperm.xlu1 %2884, %v1366_v13   ;;  %v611_v13 = vmul.f32 %v3267_v23, %v3237_v0 }
  0xaf   : > { %v3322_v19 = vpop.permute.xlu1 %505  ;;  %894 = vmatprep.subr.bf16.mxu0 %v798_v16  ;;  %v546_v16 = vmul.f32 %v3276_v26, %v3317_v60 }
  0xb0   : > { %895 = vmatpush1.bf16.msra.mxu0 %v797_v17  ;;  %v511_v17 = vpop.permute.xlu0 %510  ;;  %v627_v31 = vadd.f32 %v611_v13, %v545_v15  ;;  %v547_v0 = vmul.f32 %v3273_v25, %v3322_v19  ;;  %v548_v33 = vmul.f32 %v3276_v26, %v3322_v19 }
  0xb1   : > { %v628_v32 = vadd.f32 %v612_v14, %v546_v16  ;;  %v549_v47 = vmul.f32 %v3273_v25, %v511_v17  ;;  %v550_v54 = vmul.f32 %v3276_v26, %v511_v17 }
  0xb2   : > { %1514 = vperm.xlu1 %2884, %v1384_v20  }
  0xb4   : > { %v575_v22 = vpop.permute.xlu1 %574 }
  0xb5   : > { %v613_v27 = vmul.f32 %v3267_v23, %v575_v22  ;;  %v614_v29 = vmul.f32 %v3270_v24, %v575_v22 }
  0xb6   : > { %1434 = vperm.xlu1 %2884, %v1368_v21  }
  0xb7   : > { %v629_v41 = vadd.f32 %v613_v27, %v547_v0  ;;  %v630_v19 = vadd.f32 %v614_v29, %v548_v33  ;;  %v2885_v27 = vld [vmem:[%s3946_s4] sm:$0xff]   ;;  %v2886_v29 = vld [vmem:[%s3946_s4 + $0x8] sm:$0xff]  }
  0xb9   : > { %v653_v37 = vpop.permute.xlu1 %652 }
  0xba   : > { %1524 = vperm.xlu1 %2884, %v1386_v30   ;;  %v693_v20 = vmul.f32 %v3292_v35, %v653_v37  ;;  %v694_v21 = vmul.f32 %v3294_v36, %v653_v37  ;;  %v695_v37 = vmul.f32 %v3292_v35, %v3219_v58 }
  0xbc   : > { %v709_v22 = vadd.f32 %v693_v20, %v627_v31  ;;  %v710_v18 = vadd.f32 %v694_v21, %v628_v32  ;;  %v2888_v31 = vld [vmem:[%s3946_s4 + $0x18] sm:$0xff]  }
  0xbe   : > { %1444 = vperm.xlu1 %2884, %v1370_v42   ;;  %v738_v45 = vpop.permute.xlu1 %737  ;;  %v748_v42 = vpop.permute.xlu0 %747 }
  0xbf   : > { %v769_v52 = vadd.f32 %v738_v45, %v705_v48  ;;  %v770_v28 = vadd.f32 %v738_v45, %v706_v49 }
  0xc1   : > { %v785_v62 = vmax.f32 %v769_v52, 0.0  ;;  %v786_v46 = vmax.f32 %v770_v28, 0.0  ;;  %v774_v52 = vadd.f32 %v748_v42, %v710_v18  ;;  %v773_v28 = vadd.f32 %v748_v42, %v709_v22 }
  0xc2   : > { %1534 = vperm.xlu1 %2884, %v1388_v51   ;;  %v743_v55 = vpop.permute.xlu1 %742 }
  0xc3   : > { %v771_v56 = vadd.f32 %v743_v55, %v707_v53  ;;  %v772_v59 = vadd.f32 %v743_v55, %v708_v50  ;;  %v711_v50 = vadd.f32 %v695_v37, %v629_v41 }
  0xc5   : > { %v787_v63 = vmax.f32 %v771_v56, 0.0  ;;  %v788_v1 = vmax.f32 %v772_v59, 0.0 }
  0xc6   : > { %1454 = vperm.xlu1 %2884, %v1372_v61   ;;  %v516_v3 = vpop.permute.xlu1 %515 }
  0xc7   : > { %v800_v6 = vpack.c.bf16 %v788_v1, %v786_v46  ;;  %v799_v9 = vpack.c.bf16 %v787_v63, %v785_v62  ;;  %v551_v60 = vmul.f32 %v3273_v25, %v516_v3  ;;  %v552_v34 = vmul.f32 %v3276_v26, %v516_v3  ;;  %v763_v25 = vpop.permute.xlu0 %762 }
  0xc8   : > { %v790_v63 = vmax.f32 %v774_v52, 0.0  ;;  %v789_v1 = vmax.f32 %v773_v28, 0.0 }
  0xc9   : > { %896 = vmatprep.subr.bf16.mxu0 %v800_v6  ;;  %v633_v48 = vadd.f32 %v617_v39, %v551_v60  ;;  %v634_v49 = vadd.f32 %v618_v40, %v552_v34 }
  0xca   : > { %1544 = vperm.xlu1 %2884, %v1390_v8   ;;  %897 = vmatpush1.bf16.msra.mxu0 %v799_v9 }
  0xcb   : > { %v579_v10 = vpop.permute.xlu1 %578  ;;  %v829_v34 = vpop.permute.xlu0 %828 }
  0xcc   : > { %v615_v43 = vmul.f32 %v3267_v23, %v579_v10  ;;  %v616_v44 = vmul.f32 %v3270_v24, %v579_v10  ;;  %v712_v24 = vadd.f32 %v696_v38, %v630_v19 }
  0xce   : > { %1464 = vperm.xlu1 %2884, %v1374_v11   ;;  %v631_v55 = vadd.f32 %v615_v43, %v549_v47  ;;  %v632_v56 = vadd.f32 %v616_v44, %v550_v54 }
  0xcf   : > { %v839_v54 = vpop.permute.xlu0 %838 }
  0xd0   : > { %v661_v30 = vpop.permute.xlu1 %660 }
  0xd1   : > { %v697_v12 = vmul.f32 %v3292_v35, %v661_v30  ;;  %v698_v51 = vmul.f32 %v3294_v36, %v661_v30  ;;  %v2887_v30 = vld [vmem:[%s3946_s4 + $0x10] sm:$0xff]  }
  0xd3   : > { %v713_v46 = vadd.f32 %v697_v12, %v631_v55  ;;  %v714_v26 = vadd.f32 %v698_v51, %v632_v56 }
  0xd4   : > { %v665_v7 = vpop.permute.xlu1 %664 }
  0xd5   : > { %v699_v45 = vmul.f32 %v3292_v35, %v665_v7  ;;  %v700_v58 = vmul.f32 %v3294_v36, %v665_v7 }
  0xd7   : > { %v715_v53 = vadd.f32 %v699_v45, %v633_v48  ;;  %v716_v23 = vadd.f32 %v700_v58, %v634_v49 }
  0xd9   : > { %v753_v59 = vpop.permute.xlu1 %752  ;;  %v780_v6 = vadd.f32 %v763_v25, %v716_v23  ;;  %v779_v36 = vadd.f32 %v763_v25, %v715_v53  ;;  %v849_v25 = vpop.permute.xlu0 %848 }
  0xda   : > { %v775_v61 = vadd.f32 %v753_v59, %v711_v50  ;;  %v776_v62 = vadd.f32 %v753_v59, %v712_v24 }
  0xdb   : > { %v796_v16 = vmax.f32 %v780_v6, 0.0  ;;  %v795_v17 = vmax.f32 %v779_v36, 0.0 }
  0xdc   : > { %v791_v3 = vmax.f32 %v775_v61, 0.0  ;;  %v792_v35 = vmax.f32 %v776_v62, 0.0 }
  0xdd   : > { %v758_v8 = vpop.permute.xlu1 %757 }
  0xde   : > { %v777_v9 = vadd.f32 %v758_v8, %v713_v46  ;;  %v778_v10 = vadd.f32 %v758_v8, %v714_v26  ;;  %v802_v11 = vpack.c.bf16 %v792_v35, %v790_v63  ;;  %v801_v13 = vpack.c.bf16 %v791_v3, %v789_v1 }
  0xe0   : > { %v793_v14 = vmax.f32 %v777_v9, 0.0  ;;  %v794_v15 = vmax.f32 %v778_v10, 0.0  ;;  %898 = vmatprep.subr.bf16.mxu0 %v802_v11 }
  0xe1   : > { %899 = vmatpush1.bf16.msra.mxu0 %v801_v13  ;;  %v824_v32 = vpop.permute.xlu1 %823 }
  0xe2   : > { %v804_v20 = vpack.c.bf16 %v796_v16, %v794_v15  ;;  %v803_v21 = vpack.c.bf16 %v795_v17, %v793_v14  ;;  %v859_v16 = vpop.permute.xlu0 %858 }
  0xe4   : > { %900 = vmatprep.subr.bf16.mxu0 %v804_v20 }
  0xe5   : > { %901 = vmatpush1.bf16.msra.mxu0 %v803_v21  ;;  %v834_v43 = vpop.permute.xlu1 %833 }
  0xe8   : > { %2705 = vmatmul.mubr.msk.bf16.vlgmr.msra.gmra.mrb[0].mxu0 %vm881_vm0, %v2885_v27 }
  0xe9   : > { %936 = vmatprep.mubr.bf16.mxu0 %v2954_v5  ;;  %v844_v55 = vpop.permute.xlu1 %843 }
  0xed   : > { %v854_v10 = vpop.permute.xlu1 %853 }
  0xf0   : > { %2706 = vmatmul.mubr.msk.bf16.gmra.mrb[4].mxu0 %vm881_vm0, %v2886_v29 }
  0xf1   : > { %946 = vmatprep.mubr.bf16.mxu0 %v2954_v5 }
  0xf8   : > { %2707 = vmatmul.mubr.msk.bf16.gmra.mrb[8].mxu0 %vm881_vm0, %v2887_v30 }
  0xf9   : > { %956 = vmatprep.mubr.bf16.mxu0 %v2954_v5 }
 0x100   : > { %2708 = vmatmul.mubr.msk.bf16.gmra.mrb[12].mxu0 %vm881_vm0, %v2888_v31 }
 0x101   : > { %1680 = vmatprep.mubr.bf16.mxu0 %v2954_v5 }
 0x1bb   : > { %v928_v0 = vpop.f32.mrb[0].mxu0 }
 0x1bc   : > { %v929_v33 = vadd.f32 %v928_v0, %v824_v32  ;;  %v930_v60 = vpop.f32.mrb[1].mxu0 }
 0x1bd   : > { %v931_v37 = vadd.f32 %v930_v60, %v824_v32  ;;  %v932_v38 = vpop.f32.mrb[2].mxu0 }
 0x1be   : > { %v933_v22 = vadd.f32 %v932_v38, %v829_v34  ;;  %v934_v18 = vpop.f32.mrb[3].mxu0  ;;  %v967_v40 = vmax.f32 %v929_v33, 0.0  ;;  %v2891_v38 = vld [vmem:[%s3948_s6 + $0x10] sm:$0xff]  }
 0x1bf   : > { %v935_v39 = vadd.f32 %v934_v18, %v829_v34  ;;  %v968_v19 = vmax.f32 %v931_v37, 0.0  ;;  %v2889_v34 = vld [vmem:[%s3948_s6] sm:$0xff]   ;;  %v2890_v37 = vld [vmem:[%s3948_s6 + $0x8] sm:$0xff]  }
 0x1c0   : > { %v969_v41 = vmax.f32 %v933_v22, 0.0  ;;  %v2892_v22 = vld [vmem:[%s3948_s6 + $0x18] sm:$0xff]   ;;  %v2893_v18 = vld [vmem:[%s3948_s6 + $0x20] sm:$0xff]  }
 0x1c1   : > { %v970_v7 = vmax.f32 %v935_v39, 0.0  ;;  %v2894_v39 = vld [vmem:[%s3948_s6 + $0x28] sm:$0xff]  }
 0x1c2   : > { %v983_v42 = vpack.c.bf16 %v969_v41, %v967_v40  ;;  %v2895_v40 = vld [vmem:[%s3948_s6 + $0x30] sm:$0xff]   ;;  %v2896_v41 = vld [vmem:[%s3948_s6 + $0x38] sm:$0xff]  }
 0x1c3   : > { %v938_v44 = vpop.f32.mrb[4].mxu0  ;;  %v984_v45 = vpack.c.bf16 %v970_v7, %v968_v19  ;;  %v1026_v19 = vpop.permute.xlu1 %1025 }
 0x1c4   : > { %v939_v58 = vadd.f32 %v938_v44, %v834_v43  ;;  %v940_v47 = vpop.f32.mrb[5].mxu0  ;;  %v1031_v44 = vpop.permute.xlu0 %1030 }
 0x1c5   : > { %v941_v48 = vadd.f32 %v940_v47, %v834_v43  ;;  %v942_v49 = vpop.f32.mrb[6].mxu0  ;;  %1167 = vmatprep.subr.bf16.mxu1 %v984_v45 }
 0x1c6   : > { %v943_v12 = vadd.f32 %v942_v49, %v839_v54  ;;  %v944_v51 = vpop.f32.mrb[7].mxu0  ;;  %1168 = vmatpush1.bf16.msra.mxu1 %v983_v42  ;;  %v971_v28 = vmax.f32 %v939_v58, 0.0 }
 0x1c7   : > { %v945_v52 = vadd.f32 %v944_v51, %v839_v54  ;;  %v972_v23 = vmax.f32 %v941_v48, 0.0 }
 0x1c8   : > { %v973_v53 = vmax.f32 %v943_v12, 0.0 }
 0x1c9   : > { %v974_v50 = vmax.f32 %v945_v52, 0.0 }
 0x1ca   : > { %v985_v24 = vpack.c.bf16 %v973_v53, %v971_v28  ;;  %v1036_v53 = vpop.permute.xlu1 %1035 }
 0x1cb   : > { %v986_v56 = vpack.c.bf16 %v974_v50, %v972_v23  ;;  %v948_v59 = vpop.f32.mrb[8].mxu0 }
 0x1cc   : > { %v949_v61 = vadd.f32 %v948_v59, %v844_v55  ;;  %v950_v62 = vpop.f32.mrb[9].mxu0 }
 0x1cd   : > { %v951_v46 = vadd.f32 %v950_v62, %v844_v55  ;;  %v952_v26 = vpop.f32.mrb[10].mxu0  ;;  %1169 = vmatprep.subr.bf16.mxu1 %v986_v56  ;;  %v1041_v56 = vpop.permute.xlu0 %1040 }
 0x1ce   : > { %v953_v63 = vadd.f32 %v952_v26, %v849_v25  ;;  %v954_v1 = vpop.f32.mrb[11].mxu0  ;;  %1170 = vmatpush1.bf16.msra.mxu1 %v985_v24  ;;  %v975_v35 = vmax.f32 %v949_v61, 0.0 }
 0x1cf   : > { %v955_v3 = vadd.f32 %v954_v1, %v849_v25  ;;  %v976_v36 = vmax.f32 %v951_v46, 0.0 }
 0x1d0   : > { %v977_v6 = vmax.f32 %v953_v63, 0.0 }
 0x1d1   : > { %v978_v8 = vmax.f32 %v955_v3, 0.0 }
 0x1d2   : > { %v987_v9 = vpack.c.bf16 %v977_v6, %v975_v35  ;;  %v1046_v6 = vpop.permute.xlu1 %1045 }
 0x1d3   : > { %v988_v11 = vpack.c.bf16 %v978_v8, %v976_v36  ;;  %v958_v13 = vpop.f32.mrb[12].mxu0 }
 0x1d4   : > { %v959_v14 = vadd.f32 %v958_v13, %v854_v10  ;;  %v960_v15 = vpop.f32.mrb[13].mxu0 }
 0x1d5   : > { %v961_v17 = vadd.f32 %v960_v15, %v854_v10  ;;  %v962_v20 = vpop.f32.mrb[14].mxu0  ;;  %1171 = vmatprep.subr.bf16.mxu1 %v988_v11  ;;  %v1051_v11 = vpop.permute.xlu0 %1050 }
 0x1d6   : > { %v963_v21 = vadd.f32 %v962_v20, %v859_v16  ;;  %v964_v27 = vpop.f32.mrb[15].mxu0  ;;  %1172 = vmatpush1.bf16.msra.mxu1 %v987_v9  ;;  %v979_v30 = vmax.f32 %v959_v14, 0.0 }
 0x1d7   : > { %v965_v29 = vadd.f32 %v964_v27, %v859_v16  ;;  %v980_v32 = vmax.f32 %v961_v17, 0.0 }
 0x1d8   : > { %v981_v31 = vmax.f32 %v963_v21, 0.0 }
 0x1d9   : > { %v982_v0 = vmax.f32 %v965_v29, 0.0 }
 0x1da   : > { %v989_v33 = vpack.c.bf16 %v981_v31, %v979_v30  ;;  %v1056_v31 = vpop.permute.xlu1 %1055 }
 0x1db   : > { %v990_v60 = vpack.c.bf16 %v982_v0, %v980_v32 }
 0x1dd   : > { %1173 = vmatprep.subr.bf16.mxu1 %v990_v60 }
 0x1de   : > { %1174 = vmatpush1.bf16.msra.mxu1 %v989_v33 }
 0x1e1   : > { %2717 = vmatmul.mubr.msk.bf16.vlgmr.msra.gmra.mrb[0].mxu1 %vm881_vm0, %v2889_v34  ;;  %v1061_v34 = vpop.permute.xlu0 %1060 }
 0x1e2   : > { %1209 = vmatprep.mubr.bf16.mxu1 %v2954_v5 }
 0x1e9   : > { %2718 = vmatmul.mubr.msk.bf16.gmra.mrb[4].mxu1 %vm881_vm0, %v2890_v37 }
 0x1ea   : > { %1219 = vmatprep.mubr.bf16.mxu1 %v2954_v5 }
 0x1f1   : > { %2719 = vmatmul.mubr.msk.bf16.gmra.mrb[8].mxu1 %vm881_vm0, %v2891_v38 }
 0x1f2   : > { %1229 = vmatprep.mubr.bf16.mxu1 %v2954_v5 }
 0x1f9   : > { %2720 = vmatmul.mubr.msk.bf16.gmra.mrb[12].mxu1 %vm881_vm0, %v2892_v22 }
 0x1fa   : > { %1239 = vmatprep.mubr.bf16.mxu1 %v2954_v5 }
 0x201   : > { %2721 = vmatmul.mubr.msk.bf16.gmra.mrb[16].mxu1 %vm881_vm0, %v2893_v18 }
 0x202   : > { %1249 = vmatprep.mubr.bf16.mxu1 %v2954_v5 }
 0x209   : > { %2722 = vmatmul.mubr.msk.bf16.gmra.mrb[20].mxu1 %vm881_vm0, %v2894_v39 }
 0x20a   : > { %1259 = vmatprep.mubr.bf16.mxu1 %v2954_v5 }
 0x211   : > { %2723 = vmatmul.mubr.msk.bf16.gmra.mrb[24].mxu1 %vm881_vm0, %v2895_v40 }
 0x212   : > { %1269 = vmatprep.mubr.bf16.mxu1 %v2954_v5 }
 0x219   : > { %2724 = vmatmul.mubr.msk.bf16.gmra.mrb[28].mxu1 %vm881_vm0, %v2896_v41 }
 0x2b4   : > { %v1201_v7 = vpop.f32.mrb[0].mxu1 }
 0x2b5   : > { %v1202_v42 = vadd.f32 %v1201_v7, %v1026_v19  ;;  %v1203_v43 = vpop.f32.mrb[1].mxu1 }
 0x2b6   : > { %v1204_v45 = vadd.f32 %v1203_v43, %v1026_v19  ;;  %v1205_v58 = vpop.f32.mrb[2].mxu1  ;;  %v1066_v43 = vpop.permute.xlu1 %1065 }
 0x2b7   : > { %v1206_v47 = vadd.f32 %v1205_v58, %v1031_v44  ;;  %v1207_v54 = vpop.f32.mrb[3].mxu1  ;;  %v1280_v49 = vmax.f32 %v1202_v42, 0.0 }
 0x2b8   : > { %v1208_v48 = vadd.f32 %v1207_v54, %v1031_v44  ;;  %v1281_v51 = vmax.f32 %v1204_v45, 0.0  ;;  %v1071_v54 = vpop.permute.xlu0 %1070 }
 0x2b9   : > { %v1282_v12 = vmax.f32 %v1206_v47, 0.0 }
 0x2ba   : > { %v1283_v52 = vmax.f32 %v1208_v48, 0.0 }
 0x2bb   : > { %v1312_v28 = vpack.c.bf16 %v1282_v12, %v1280_v49 }
 0x2bc   : > { %v1313_v23 = vpack.c.bf16 %v1283_v52, %v1281_v51  ;;  %v1211_v50 = vpop.f32.mrb[4].mxu1 }
 0x2bd   : > { %v1212_v24 = vadd.f32 %v1211_v50, %v1036_v53  ;;  %v1213_v55 = vpop.f32.mrb[5].mxu1 }
 0x2be   : > { %v1214_v59 = vadd.f32 %v1213_v55, %v1036_v53  ;;  %v1215_v61 = vpop.f32.mrb[6].mxu1  ;;  %1648 = vmatprep.subr.bf16.mxu0 %v1313_v23  ;;  %v1076_v55 = vpop.permute.xlu1 %1075 }
 0x2bf   : > { %v1216_v62 = vadd.f32 %v1215_v61, %v1041_v56  ;;  %v1217_v25 = vpop.f32.mrb[7].mxu1  ;;  %1649 = vmatpush1.bf16.msra.mxu0 %v1312_v28  ;;  %v1284_v26 = vmax.f32 %v1212_v24, 0.0 }
 0x2c0   : > { %v1218_v46 = vadd.f32 %v1217_v25, %v1041_v56  ;;  %v1285_v1 = vmax.f32 %v1214_v59, 0.0  ;;  %v1081_v25 = vpop.permute.xlu0 %1080 }
 0x2c1   : > { %v1286_v63 = vmax.f32 %v1216_v62, 0.0 }
 0x2c2   : > { %v1287_v3 = vmax.f32 %v1218_v46, 0.0 }
 0x2c3   : > { %v1314_v35 = vpack.c.bf16 %v1286_v63, %v1284_v26 }
 0x2c4   : > { %v1315_v36 = vpack.c.bf16 %v1287_v3, %v1285_v1  ;;  %v1221_v8 = vpop.f32.mrb[8].mxu1 }
 0x2c5   : > { %v1222_v9 = vadd.f32 %v1221_v8, %v1046_v6  ;;  %v1223_v10 = vpop.f32.mrb[9].mxu1 }
 0x2c6   : > { %v1224_v13 = vadd.f32 %v1223_v10, %v1046_v6  ;;  %v1225_v14 = vpop.f32.mrb[10].mxu1  ;;  %1650 = vmatprep.subr.bf16.mxu0 %v1315_v36  ;;  %v1086_v10 = vpop.permute.xlu1 %1085 }
 0x2c7   : > { %v1226_v15 = vadd.f32 %v1225_v14, %v1051_v11  ;;  %v1227_v16 = vpop.f32.mrb[11].mxu1  ;;  %1651 = vmatpush1.bf16.msra.mxu0 %v1314_v35  ;;  %v1288_v20 = vmax.f32 %v1222_v9, 0.0 }
 0x2c8   : > { %v1228_v17 = vadd.f32 %v1227_v16, %v1051_v11  ;;  %v1289_v27 = vmax.f32 %v1224_v13, 0.0  ;;  %v1091_v16 = vpop.permute.xlu0 %1090 }
 0x2c9   : > { %v1290_v21 = vmax.f32 %v1226_v15, 0.0 }
 0x2ca   : > { %v1291_v29 = vmax.f32 %v1228_v17, 0.0 }
 0x2cb   : > { %v1316_v30 = vpack.c.bf16 %v1290_v21, %v1288_v20 }
 0x2cc   : > { %v1317_v32 = vpack.c.bf16 %v1291_v29, %v1289_v27  ;;  %v1231_v0 = vpop.f32.mrb[12].mxu1 }
 0x2cd   : > { %v1232_v33 = vadd.f32 %v1231_v0, %v1056_v31  ;;  %v1233_v60 = vpop.f32.mrb[13].mxu1 }
 0x2ce   : > { %v1234_v37 = vadd.f32 %v1233_v60, %v1056_v31  ;;  %v1235_v38 = vpop.f32.mrb[14].mxu1  ;;  %1652 = vmatprep.subr.bf16.mxu0 %v1317_v32  ;;  %v1096_v60 = vpop.permute.xlu1 %1095 }
 0x2cf   : > { %v1236_v22 = vadd.f32 %v1235_v38, %v1061_v34  ;;  %v1237_v18 = vpop.f32.mrb[15].mxu1  ;;  %1653 = vmatpush1.bf16.msra.mxu0 %v1316_v30  ;;  %v1292_v40 = vmax.f32 %v1232_v33, 0.0 }
 0x2d0   : > { %v1238_v39 = vadd.f32 %v1237_v18, %v1061_v34  ;;  %v1293_v19 = vmax.f32 %v1234_v37, 0.0  ;;  %v1101_v18 = vpop.permute.xlu0 %1100 }
 0x2d1   : > { %v1294_v41 = vmax.f32 %v1236_v22, 0.0 }
 0x2d2   : > { %v1295_v7 = vmax.f32 %v1238_v39, 0.0 }
 0x2d3   : > { %v1318_v42 = vpack.c.bf16 %v1294_v41, %v1292_v40 }
 0x2d4   : > { %v1319_v44 = vpack.c.bf16 %v1295_v7, %v1293_v19  ;;  %v1241_v45 = vpop.f32.mrb[16].mxu1 }
 0x2d5   : > { %v1242_v58 = vadd.f32 %v1241_v45, %v1066_v43  ;;  %v1243_v47 = vpop.f32.mrb[17].mxu1 }
 0x2d6   : > { %v1244_v48 = vadd.f32 %v1243_v47, %v1066_v43  ;;  %v1245_v49 = vpop.f32.mrb[18].mxu1  ;;  %1654 = vmatprep.subr.bf16.mxu0 %v1319_v44 }
 0x2d7   : > { %v1246_v12 = vadd.f32 %v1245_v49, %v1071_v54  ;;  %v1247_v51 = vpop.f32.mrb[19].mxu1  ;;  %1655 = vmatpush1.bf16.msra.mxu0 %v1318_v42  ;;  %v1296_v28 = vmax.f32 %v1242_v58, 0.0  ;;  %v2899_v49 = vld [vmem:[%s3950_s8 + $0x10] sm:$0xff]  }
 0x2d8   : > { %v1248_v52 = vadd.f32 %v1247_v51, %v1071_v54  ;;  %v1297_v23 = vmax.f32 %v1244_v48, 0.0  ;;  %v2897_v54 = vld [vmem:[%s3950_s8] sm:$0xff]   ;;  %v2898_v48 = vld [vmem:[%s3950_s8 + $0x8] sm:$0xff]  }
 0x2d9   : > { %v1298_v53 = vmax.f32 %v1246_v12, 0.0  ;;  %v2900_v12 = vld [vmem:[%s3950_s8 + $0x18] sm:$0xff]   ;;  %v2901_v51 = vld [vmem:[%s3950_s8 + $0x20] sm:$0xff]  }
 0x2da   : > { %v1299_v50 = vmax.f32 %v1248_v52, 0.0  ;;  %v2902_v52 = vld [vmem:[%s3950_s8 + $0x28] sm:$0xff]  }
 0x2db   : > { %v1320_v24 = vpack.c.bf16 %v1298_v53, %v1296_v28  ;;  %v2903_v28 = vld [vmem:[%s3950_s8 + $0x30] sm:$0xff]   ;;  %v2904_v53 = vld [vmem:[%s3950_s8 + $0x38] sm:$0xff]  }
 0x2dc   : > { %v1321_v56 = vpack.c.bf16 %v1299_v50, %v1297_v23  ;;  %v1251_v59 = vpop.f32.mrb[20].mxu1  ;;  %v2905_v23 = vld [vmem:[%s3950_s8 + $0x40] sm:$0xff]   ;;  %v2906_v50 = vld [vmem:[%s3950_s8 + $0x48] sm:$0xff]  }
 0x2dd   : > { %v1252_v61 = vadd.f32 %v1251_v59, %v1076_v55  ;;  %v1253_v62 = vpop.f32.mrb[21].mxu1  ;;  %v2910_v59 = vld [vmem:[%s3950_s8 + $0x68] sm:$0xff]  }
 0x2de   : > { %v1254_v46 = vadd.f32 %v1253_v62, %v1076_v55  ;;  %v1255_v26 = vpop.f32.mrb[22].mxu1  ;;  %1656 = vmatprep.subr.bf16.mxu0 %v1321_v56  ;;  %v2908_v55 = vld [vmem:[%s3950_s8 + $0x58] sm:$0xff]   ;;  %v2909_v56 = vld [vmem:[%s3950_s8 + $0x60] sm:$0xff]  }
 0x2df   : > { %v1256_v63 = vadd.f32 %v1255_v26, %v1081_v25  ;;  %v1257_v1 = vpop.f32.mrb[23].mxu1  ;;  %1657 = vmatpush1.bf16.msra.mxu0 %v1320_v24  ;;  %v1300_v35 = vmax.f32 %v1252_v61, 0.0  ;;  %v2907_v24 = vld [vmem:[%s3950_s8 + $0x50] sm:$0xff]   ;;  %v2912_v62 = vld [vmem:[%s3950_s8 + $0x78] sm:$0xff]  }
 0x2e0   : > { %v1258_v3 = vadd.f32 %v1257_v1, %v1081_v25  ;;  %v1301_v36 = vmax.f32 %v1254_v46, 0.0  ;;  %v2911_v61 = vld [vmem:[%s3950_s8 + $0x70] sm:$0xff]   ;;  %v3524_v25 = vpop.permute.xlu1 %1474  ;;  %v3526_v46 = vpop.permute.xlu0 %1479 }
 0x2e1   : > { %v1302_v6 = vmax.f32 %v1256_v63, 0.0 }
 0x2e2   : > { %v1303_v8 = vmax.f32 %v1258_v3, 0.0 }
 0x2e3   : > { %v1322_v9 = vpack.c.bf16 %v1302_v6, %v1300_v35 }
 0x2e4   : > { %v1323_v11 = vpack.c.bf16 %v1303_v8, %v1301_v36  ;;  %v1261_v13 = vpop.f32.mrb[24].mxu1  ;;  %v1395_v26 = vpop.permute.xlu1 %1394 }
 0x2e5   : > { %v1262_v14 = vadd.f32 %v1261_v13, %v1086_v10  ;;  %v1263_v15 = vpop.f32.mrb[25].mxu1  ;;  %v1400_v63 = vpop.permute.xlu0 %1399 }
 0x2e6   : > { %v1264_v17 = vadd.f32 %v1263_v15, %v1086_v10  ;;  %v1265_v20 = vpop.f32.mrb[26].mxu1  ;;  %1658 = vmatprep.subr.bf16.mxu0 %v1323_v11 }
 0x2e7   : > { %v1266_v21 = vadd.f32 %v1265_v20, %v1091_v16  ;;  %v1267_v27 = vpop.f32.mrb[27].mxu1  ;;  %1659 = vmatpush1.bf16.msra.mxu0 %v1322_v9  ;;  %v1304_v30 = vmax.f32 %v1262_v14, 0.0  ;;  %v1905_v9 = vld [vmem:[%s3943_s1] sm:$0x3] }
 0x2e8   : > { %v1268_v29 = vadd.f32 %v1267_v27, %v1091_v16  ;;  %v1305_v32 = vmax.f32 %v1264_v17, 0.0  ;;  %v3528_v1 = vpop.permute.xlu1 %1484  ;;  %v3540_v13 = vrot.slane %v1905_v9, %v3244_v4 }
 0x2e9   : > { %v1306_v31 = vmax.f32 %v1266_v21, 0.0  ;;  %v3530_v3 = vpop.permute.xlu0 %1489 }
 0x2ea   : > { %v1307_v0 = vmax.f32 %v1268_v29, 0.0 }
 0x2eb   : > { %v1324_v33 = vpack.c.bf16 %v1306_v31, %v1304_v30 }
 0x2ec   : > { %v1325_v34 = vpack.c.bf16 %v1307_v0, %v1305_v32  ;;  %v1271_v37 = vpop.f32.mrb[28].mxu1  ;;  %v1405_v35 = vpop.permute.xlu1 %1404  ;;  %v3547_v32 = vrot.slane %v1905_v9, %v3242_v2 }
 0x2ed   : > { %v1272_v38 = vadd.f32 %v1271_v37, %v1096_v60  ;;  %v1273_v22 = vpop.f32.mrb[29].mxu1  ;;  %v1410_v6 = vpop.permute.xlu0 %1409 }
 0x2ee   : > { %v1274_v39 = vadd.f32 %v1273_v22, %v1096_v60  ;;  %v1275_v40 = vpop.f32.mrb[30].mxu1  ;;  %1660 = vmatprep.subr.bf16.mxu0 %v1325_v34 }
 0x2ef   : > { %v1276_v41 = vadd.f32 %v1275_v40, %v1101_v18  ;;  %v1277_v19 = vpop.f32.mrb[31].mxu1  ;;  %1661 = vmatpush1.bf16.msra.mxu0 %v1324_v33  ;;  %v1308_v42 = vmax.f32 %v1272_v38, 0.0 }
 0x2f0   : > { %v1278_v7 = vadd.f32 %v1277_v19, %v1101_v18  ;;  %v1309_v44 = vmax.f32 %v1274_v39, 0.0  ;;  %v3532_v36 = vpop.permute.xlu1 %1494 }
 0x2f1   : > { %v1310_v43 = vmax.f32 %v1276_v41, 0.0 }
 0x2f2   : > { %v1311_v45 = vmax.f32 %v1278_v7, 0.0 }
 0x2f3   : > { %v1326_v58 = vpack.c.bf16 %v1310_v43, %v1308_v42 }
 0x2f4   : > { %v1327_v47 = vpack.c.bf16 %v1311_v45, %v1309_v44  ;;  %v1415_v8 = vpop.permute.xlu1 %1414 }
 0x2f6   : > { %1662 = vmatprep.subr.bf16.mxu0 %v1327_v47 }
 0x2f7   : > { %1663 = vmatpush1.bf16.msra.mxu0 %v1326_v58 }
 0x2f8   : > { %v3542_v16 = vpop.permute.xlu1 %1504 }
 0x2fa   : > { %1681 = vmatmul.mubr.bf16.vlgmr.msra.gmra.mrb[16].mxu0 %v2897_v54 }
 0x2fb   : > { %1690 = vmatprep.mubr.bf16.mxu0 %v2954_v5 }
 0x2fc   : > { %v1425_v37 = vpop.permute.xlu1 %1424 }
 0x300   : > { %v3554_v54 = vpop.permute.xlu1 %1514 }
 0x302   : > { %1691 = vmatmul.mubr.bf16.gmra.mrb[20].mxu0 %v2898_v48 }
 0x303   : > { %1700 = vmatprep.mubr.bf16.mxu0 %v2954_v5 }
 0x30a   : > { %1701 = vmatmul.mubr.bf16.gmra.mrb[24].mxu0 %v2899_v49 }
 0x30b   : > { %1710 = vmatprep.mubr.bf16.mxu0 %v2954_v5 }
 0x312   : > { %1711 = vmatmul.mubr.bf16.gmra.mrb[28].mxu0 %v2900_v12 }
 0x313   : > { %1720 = vmatprep.mubr.bf16.mxu0 %v2954_v5 }
 0x31a   : > { %1721 = vmatmul.mubr.bf16.gmra.mrb[32].mxu0 %v2901_v51 }
 0x31b   : > { %1730 = vmatprep.mubr.bf16.mxu0 %v2954_v5 }
 0x322   : > { %1731 = vmatmul.mubr.bf16.gmra.mrb[36].mxu0 %v2902_v52 }
 0x323   : > { %1740 = vmatprep.mubr.bf16.mxu0 %v2954_v5 }
 0x32a   : > { %1741 = vmatmul.mubr.bf16.gmra.mrb[40].mxu0 %v2903_v28 }
 0x32b   : > { %1750 = vmatprep.mubr.bf16.mxu0 %v2954_v5 }
 0x332   : > { %1751 = vmatmul.mubr.bf16.gmra.mrb[44].mxu0 %v2904_v53 }
 0x333   : > { %1760 = vmatprep.mubr.bf16.mxu0 %v2954_v5 }
 0x33a   : > { %1761 = vmatmul.mubr.bf16.gmra.mrb[48].mxu0 %v2905_v23 }
 0x33b   : > { %1770 = vmatprep.mubr.bf16.mxu0 %v2954_v5 }
 0x342   : > { %1771 = vmatmul.mubr.bf16.gmra.mrb[52].mxu0 %v2906_v50 }
 0x343   : > { %1780 = vmatprep.mubr.bf16.mxu0 %v2954_v5 }
 0x34a   : > { %1781 = vmatmul.mubr.bf16.gmra.mrb[56].mxu0 %v2907_v24 }
 0x34b   : > { %1790 = vmatprep.mubr.bf16.mxu0 %v2954_v5 }
 0x352   : > { %1791 = vmatmul.mubr.bf16.gmra.mrb[60].mxu0 %v2908_v55 }
 0x353   : > { %1800 = vmatprep.mubr.bf16.mxu0 %v2954_v5 }
 0x35a   : > { %1801 = vmatmul.mubr.bf16.gmra.mrb[64].mxu0 %v2909_v56 }
 0x35b   : > { %1810 = vmatprep.mubr.bf16.mxu0 %v2954_v5 }
 0x362   : > { %1811 = vmatmul.mubr.bf16.gmra.mrb[68].mxu0 %v2910_v59 }
 0x363   : > { %1820 = vmatprep.mubr.bf16.mxu0 %v2954_v5 }
 0x36a   : > { %1821 = vmatmul.mubr.bf16.gmra.mrb[72].mxu0 %v2911_v61  ;;  %v1435_v61 = vpop.permute.xlu1 %1434 }
 0x36b   : > { %1830 = vmatprep.mubr.bf16.mxu0 %v2954_v5  ;;  %v3534_v5 = vpop.permute.xlu0 %1499 }
 0x36f   : > { %v1420_v10 = vpop.permute.xlu0 %1419 }
 0x372   : > { %1831 = vmatmul.mubr.bf16.gmra.mrb[76].mxu0 %v2912_v62 }
 0x373   : > { %v3544_v30 = vpop.permute.xlu0 %1509 }
 0x377   : > { %v1430_v40 = vpop.permute.xlu0 %1429 }
 0x37b   : > { %v3557_v12 = vpop.permute.xlu0 %1519 }
 0x3cd   : > { %v1682_v11 = vpop.f32.mrb[16].mxu0 }
 0x3ce   : > { %v1683_v14 = vadd.f32 %v1682_v11, %v1395_v26  ;;  %v1684_v15 = vpop.f32.mrb[17].mxu0 }
 0x3cf   : > { %v1685_v17 = vadd.f32 %v1684_v15, %v1395_v26  ;;  %v1686_v20 = vpop.f32.mrb[18].mxu0 }
 0x3d0   : > { %v1841_v21 = vmax.f32 %v1683_v14, 0.0  ;;  %v1687_v27 = vadd.f32 %v1686_v20, %v1400_v63  ;;  %v1688_v29 = vpop.f32.mrb[19].mxu0  ;;  %v3564_v20 = vpop.permute.xlu1 %1524 }
 0x3d1   : > { %v1689_v31 = vadd.f32 %v1688_v29, %v1400_v63  ;;  %v1842_v0 = vmax.f32 %v1685_v17, 0.0 }
 0x3d2   : > { %v1843_v33 = vmax.f32 %v1687_v27, 0.0  ;;  %v1917_v4 = vmul.f32 %v3540_v13, %v1841_v21 }
 0x3d3   : > { %v1844_v60 = vmax.f32 %v1689_v31, 0.0  ;;  %v1918_v39 = vmul.f32 %v3547_v32, %v1842_v0 }
 0x3d4   : > { %1983 = vmax.xlane.f32.xlu0 %v1917_v4  ;;  %v1919_v34 = vmul.f32 %v3540_v13, %v1843_v33 }
 0x3d5   : > { %v1692_v38 = vpop.f32.mrb[20].mxu0  ;;  %v1920_v2 = vmul.f32 %v3547_v32, %v1844_v60 }
 0x3d6   : > { %v1693_v22 = vadd.f32 %v1692_v38, %v1405_v35  ;;  %v1694_v18 = vpop.f32.mrb[21].mxu0  ;;  %1985 = vmax.xlane.f32.xlu1 %v1919_v34 }
 0x3d7   : > { %v1695_v41 = vadd.f32 %v1694_v18, %v1405_v35  ;;  %v1696_v19 = vpop.f32.mrb[22].mxu0 }
 0x3d8   : > { %v1845_v7 = vmax.f32 %v1693_v22, 0.0  ;;  %v1697_v42 = vadd.f32 %v1696_v19, %v1410_v6  ;;  %v1698_v43 = vpop.f32.mrb[23].mxu0  ;;  %2082 = vmax.xlane.f32.xlu0 %v1918_v39 }
 0x3d9   : > { %v1699_v44 = vadd.f32 %v1698_v43, %v1410_v6  ;;  %v1846_v45 = vmax.f32 %v1695_v41, 0.0  ;;  %v1440_v6 = vpop.permute.xlu0 %1439 }
 0x3da   : > { %v1847_v58 = vmax.f32 %v1697_v42, 0.0  ;;  %2084 = vmax.xlane.f32.xlu1 %v1920_v2  ;;  %v1921_v47 = vmul.f32 %v3540_v13, %v1845_v7 }
 0x3db   : > { %v1848_v49 = vmax.f32 %v1699_v44, 0.0  ;;  %v1922_v53 = vmul.f32 %v3547_v32, %v1846_v45 }
 0x3dc   : > { %v1923_v48 = vmul.f32 %v3540_v13, %v1847_v58  ;;  %1987 = vmax.xlane.f32.xlu0 %v1921_v47 }
 0x3dd   : > { %v1702_v51 = vpop.f32.mrb[24].mxu0  ;;  %v1924_v24 = vmul.f32 %v3547_v32, %v1848_v49  ;;  %v3567_v33 = vpop.permute.xlu0 %1529 }
 0x3de   : > { %v1703_v52 = vadd.f32 %v1702_v51, %v1415_v8  ;;  %v1704_v28 = vpop.f32.mrb[25].mxu0  ;;  %1989 = vmax.xlane.f32.xlu1 %v1923_v48 }
 0x3df   : > { %v1705_v23 = vadd.f32 %v1704_v28, %v1415_v8  ;;  %v1706_v50 = vpop.f32.mrb[26].mxu0 }
 0x3e0   : > { %v1849_v55 = vmax.f32 %v1703_v52, 0.0  ;;  %v1707_v56 = vadd.f32 %v1706_v50, %v1420_v10  ;;  %v1708_v59 = vpop.f32.mrb[27].mxu0  ;;  %2086 = vmax.xlane.f32.xlu0 %v1922_v53 }
 0x3e1   : > { %v1709_v62 = vadd.f32 %v1708_v59, %v1420_v10  ;;  %v1850_v26 = vmax.f32 %v1705_v23, 0.0  ;;  %v1450_v7 = vpop.permute.xlu0 %1449 }
 0x3e2   : > { %v1851_v63 = vmax.f32 %v1707_v56, 0.0  ;;  %2088 = vmax.xlane.f32.xlu1 %v1924_v24  ;;  %v1925_v35 = vmul.f32 %v3540_v13, %v1849_v55 }
 0x3e3   : > { %v1852_v11 = vmax.f32 %v1709_v62, 0.0  ;;  %v1926_v17 = vmul.f32 %v3547_v32, %v1850_v26 }
 0x3e4   : > { %v1927_v9 = vmul.f32 %v3540_v13, %v1851_v63  ;;  %1991 = vmax.xlane.f32.xlu0 %v1925_v35 }
 0x3e5   : > { %v1712_v8 = vpop.f32.mrb[28].mxu0  ;;  %v1928_v27 = vmul.f32 %v3547_v32, %v1852_v11  ;;  %v3577_v23 = vpop.permute.xlu0 %1539 }
 0x3e6   : > { %v1713_v14 = vadd.f32 %v1712_v8, %v1425_v37  ;;  %v1714_v15 = vpop.f32.mrb[29].mxu0  ;;  %1993 = vmax.xlane.f32.xlu1 %v1927_v9 }
 0x3e7   : > { %v1715_v21 = vadd.f32 %v1714_v15, %v1425_v37  ;;  %v1716_v10 = vpop.f32.mrb[30].mxu0  ;;  %v1445_v37 = vpop.permute.xlu1 %1444 }
 0x3e8   : > { %v1853_v29 = vmax.f32 %v1713_v14, 0.0  ;;  %v1717_v31 = vadd.f32 %v1716_v10, %v1430_v40  ;;  %v1718_v0 = vpop.f32.mrb[31].mxu0  ;;  %2090 = vmax.xlane.f32.xlu0 %v1926_v17 }
 0x3e9   : > { %v1719_v4 = vadd.f32 %v1718_v0, %v1430_v40  ;;  %v1854_v60 = vmax.f32 %v1715_v21, 0.0  ;;  %v1460_v15 = vpop.permute.xlu0 %1459 }
 0x3ea   : > { %v1855_v34 = vmax.f32 %v1717_v31, 0.0  ;;  %2092 = vmax.xlane.f32.xlu1 %v1928_v27  ;;  %v1929_v38 = vmul.f32 %v3540_v13, %v1853_v29 }
 0x3eb   : > { %v1856_v18 = vmax.f32 %v1719_v4, 0.0  ;;  %v1930_v2 = vmul.f32 %v3547_v32, %v1854_v60  ;;  %v3574_v52 = vpop.permute.xlu1 %1534 }
 0x3ec   : > { %v1931_v22 = vmul.f32 %v3540_v13, %v1855_v34  ;;  %1995 = vmax.xlane.f32.xlu0 %v1929_v38 }
 0x3ed   : > { %v1722_v39 = vpop.f32.mrb[32].mxu0  ;;  %v1932_v40 = vmul.f32 %v3547_v32, %v1856_v18 }
 0x3ee   : > { %v1723_v41 = vadd.f32 %v1722_v39, %v1435_v61  ;;  %v1724_v19 = vpop.f32.mrb[33].mxu0  ;;  %1997 = vmax.xlane.f32.xlu1 %v1931_v22 }
 0x3ef   : > { %v1725_v42 = vadd.f32 %v1724_v19, %v1435_v61  ;;  %v1726_v43 = vpop.f32.mrb[34].mxu0 }
 0x3f0   : > { %v1857_v44 = vmax.f32 %v1723_v41, 0.0  ;;  %v1727_v45 = vadd.f32 %v1726_v43, %v1440_v6  ;;  %v1728_v58 = vpop.f32.mrb[35].mxu0  ;;  %2094 = vmax.xlane.f32.xlu0 %v1930_v2 }
 0x3f1   : > { %v1729_v47 = vadd.f32 %v1728_v58, %v1440_v6  ;;  %v1858_v48 = vmax.f32 %v1725_v42, 0.0  ;;  %v1455_v6 = vpop.permute.xlu1 %1454 }
 0x3f2   : > { %v1859_v49 = vmax.f32 %v1727_v45, 0.0  ;;  %2096 = vmax.xlane.f32.xlu1 %v1932_v40  ;;  %v1933_v51 = vmul.f32 %v3540_v13, %v1857_v44 }
 0x3f3   : > { %v1860_v53 = vmax.f32 %v1729_v47, 0.0  ;;  %v1934_v24 = vmul.f32 %v3547_v32, %v1858_v48 }
 0x3f4   : > { %v1935_v28 = vmul.f32 %v3540_v13, %v1859_v49  ;;  %1999 = vmax.xlane.f32.xlu0 %v1933_v51 }
 0x3f5   : > { %v1732_v50 = vpop.f32.mrb[36].mxu0  ;;  %v1936_v62 = vmul.f32 %v3547_v32, %v1860_v53  ;;  %v3584_v0 = vpop.permute.xlu1 %1544 }
 0x3f6   : > { %v1733_v55 = vadd.f32 %v1732_v50, %v1445_v37  ;;  %v1734_v56 = vpop.f32.mrb[37].mxu0  ;;  %2001 = vmax.xlane.f32.xlu1 %v1935_v28 }
 0x3f7   : > { %v1735_v59 = vadd.f32 %v1734_v56, %v1445_v37  ;;  %v1736_v61 = vpop.f32.mrb[38].mxu0  ;;  %v3587_v37 = vpop.permute.xlu0 %1549 }
 0x3f8   : > { %v1861_v26 = vmax.f32 %v1733_v55, 0.0  ;;  %v1737_v63 = vadd.f32 %v1736_v61, %v1450_v7  ;;  %v1738_v35 = vpop.f32.mrb[39].mxu0  ;;  %2098 = vmax.xlane.f32.xlu0 %v1934_v24 }
 0x3f9   : > { %v1739_v9 = vadd.f32 %v1738_v35, %v1450_v7  ;;  %v1862_v8 = vmax.f32 %v1735_v59, 0.0  ;;  %v3591_v43 = vpop.permute.xlu1 %1464 }
 0x3fa   : > { %v1937_v11 = vmul.f32 %v3540_v13, %v1861_v26  ;;  %v1863_v14 = vmax.f32 %v1737_v63, 0.0  ;;  %2100 = vmax.xlane.f32.xlu1 %v1936_v62 }
 0x3fb   : > { %v1864_v21 = vmax.f32 %v1739_v9, 0.0  ;;  %v1938_v27 = vmul.f32 %v3547_v32, %v1862_v8  ;;  %v3597_v47 = vpop.permute.xlu0 %1469 }
 0x3fc   : > { %v1939_v17 = vmul.f32 %v3540_v13, %v1863_v14  ;;  %2003 = vmax.xlane.f32.xlu0 %v1937_v11 }
 0x3fd   : > { %v1742_v10 = vpop.f32.mrb[40].mxu0  ;;  %v1940_v34 = vmul.f32 %v3547_v32, %v1864_v21 }
 0x3fe   : > { %v1743_v29 = vadd.f32 %v1742_v10, %v1455_v6  ;;  %v1744_v31 = vpop.f32.mrb[41].mxu0  ;;  %2005 = vmax.xlane.f32.xlu1 %v1939_v17 }
 0x3ff   : > { %v1745_v4 = vadd.f32 %v1744_v31, %v1455_v6  ;;  %v1746_v60 = vpop.f32.mrb[42].mxu0 }
 0x400   : > { %v1865_v38 = vmax.f32 %v1743_v29, 0.0  ;;  %v1747_v22 = vadd.f32 %v1746_v60, %v1460_v15  ;;  %v1748_v18 = vpop.f32.mrb[43].mxu0  ;;  %2102 = vmax.xlane.f32.xlu0 %v1938_v27 }
 0x401   : > { %v1749_v39 = vadd.f32 %v1748_v18, %v1460_v15  ;;  %v1866_v19 = vmax.f32 %v1745_v4, 0.0 }
 0x402   : > { %v1941_v41 = vmul.f32 %v3540_v13, %v1865_v38  ;;  %v1867_v2 = vmax.f32 %v1747_v22, 0.0  ;;  %2104 = vmax.xlane.f32.xlu1 %v1940_v34 }
 0x403   : > { %v1868_v42 = vmax.f32 %v1749_v39, 0.0  ;;  %v1942_v44 = vmul.f32 %v3547_v32, %v1866_v19 }
 0x404   : > { %v1943_v7 = vmul.f32 %v3540_v13, %v1867_v2  ;;  %2007 = vmax.xlane.f32.xlu0 %v1941_v41 }
 0x405   : > { %v1752_v40 = vpop.f32.mrb[44].mxu0  ;;  %v1944_v49 = vmul.f32 %v3547_v32, %v1868_v42 }
 0x406   : > { %v1753_v45 = vadd.f32 %v1752_v40, %v3591_v43  ;;  %v3595_v58 = vpop.f32.mrb[45].mxu0  ;;  %2009 = vmax.xlane.f32.xlu1 %v1943_v7 }
 0x407   : > { %v1756_v48 = vpop.f32.mrb[46].mxu0 }
 0x408   : > { %v1869_v51 = vmax.f32 %v1753_v45, 0.0  ;;  %v1757_v28 = vadd.f32 %v1756_v48, %v3597_v47  ;;  %v3601_v53 = vpop.f32.mrb[47].mxu0  ;;  %2106 = vmax.xlane.f32.xlu0 %v1942_v44 }
 0x40a   : > { %v1945_v50 = vmul.f32 %v3540_v13, %v1869_v51  ;;  %v1871_v24 = vmax.f32 %v1757_v28, 0.0  ;;  %2108 = vmax.xlane.f32.xlu1 %v1944_v49 }
 0x40c   : > { %v1947_v55 = vmul.f32 %v3540_v13, %v1871_v24  ;;  %2011 = vmax.xlane.f32.xlu0 %v1945_v50 }
 0x40d   : > { %v1762_v56 = vpop.f32.mrb[48].mxu0 }
 0x40e   : > { %v1763_v59 = vadd.f32 %v1762_v56, %v3524_v25  ;;  %v1764_v61 = vpop.f32.mrb[49].mxu0  ;;  %2013 = vmax.xlane.f32.xlu1 %v1947_v55 }
 0x40f   : > { %v1765_v62 = vadd.f32 %v1764_v61, %v3524_v25  ;;  %v1766_v26 = vpop.f32.mrb[50].mxu0 }
 0x410   : > { %v1873_v63 = vmax.f32 %v1763_v59, 0.0  ;;  %v1767_v35 = vadd.f32 %v1766_v26, %v3526_v46  ;;  %v1768_v6 = vpop.f32.mrb[51].mxu0 }
 0x411   : > { %v1874_v9 = vmax.f32 %v1765_v62, 0.0  ;;  %v1769_v11 = vadd.f32 %v1768_v6, %v3526_v46 }
 0x412   : > { %v1949_v8 = vmul.f32 %v3540_v13, %v1873_v63  ;;  %v1875_v15 = vmax.f32 %v1767_v35, 0.0 }
 0x413   : > { %v1950_v14 = vmul.f32 %v3547_v32, %v1874_v9  ;;  %v1876_v17 = vmax.f32 %v1769_v11, 0.0 }
 0x414   : > { %2015 = vmax.xlane.f32.xlu1 %v1949_v8  ;;  %v1951_v29 = vmul.f32 %v3540_v13, %v1875_v15 }
 0x415   : > { %v1952_v21 = vmul.f32 %v3547_v32, %v1876_v17  ;;  %v1772_v10 = vpop.f32.mrb[52].mxu0  ;;  %2114 = vmax.xlane.f32.xlu0 %v1950_v14 }
 0x416   : > { %v1773_v25 = vadd.f32 %v1772_v10, %v3528_v1  ;;  %v1774_v27 = vpop.f32.mrb[53].mxu0 }
 0x417   : > { %v1775_v31 = vadd.f32 %v1774_v27, %v3528_v1  ;;  %v1776_v4 = vpop.f32.mrb[54].mxu0 }
 0x418   : > { %v1877_v46 = vmax.f32 %v1773_v25, 0.0  ;;  %v1777_v60 = vadd.f32 %v1776_v4, %v3530_v3  ;;  %v1778_v34 = vpop.f32.mrb[55].mxu0  ;;  %2116 = vmax.xlane.f32.xlu1 %v1952_v21 }
 0x419   : > { %v1779_v38 = vadd.f32 %v1778_v34, %v3530_v3  ;;  %2017 = vmax.xlane.f32.xlu0 %v1951_v29  ;;  %v1878_v39 = vmax.f32 %v1775_v31, 0.0 }
 0x41a   : > { %v1953_v22 = vmul.f32 %v3540_v13, %v1877_v46  ;;  %v1879_v18 = vmax.f32 %v1777_v60, 0.0 }
 0x41b   : > { %v1880_v19 = vmax.f32 %v1779_v38, 0.0  ;;  %v1954_v42 = vmul.f32 %v3547_v32, %v1878_v39 }
 0x41c   : > { %v1955_v41 = vmul.f32 %v3540_v13, %v1879_v18 }
 0x41d   : > { %v1782_v2 = vpop.f32.mrb[56].mxu0  ;;  %2019 = vmax.xlane.f32.xlu0 %v1953_v22  ;;  %v1956_v3 = vmul.f32 %v3547_v32, %v1880_v19 }
 0x41e   : > { %v1783_v1 = vadd.f32 %v1782_v2, %v3532_v36  ;;  %v1784_v7 = vpop.f32.mrb[57].mxu0  ;;  %2021 = vmax.xlane.f32.xlu1 %v1955_v41 }
 0x41f   : > { %v1785_v40 = vadd.f32 %v1784_v7, %v3532_v36  ;;  %v1786_v44 = vpop.f32.mrb[58].mxu0 }
 0x420   : > { %v1881_v45 = vmax.f32 %v1783_v1, 0.0  ;;  %v1787_v48 = vadd.f32 %v1786_v44, %v3534_v5  ;;  %v1788_v49 = vpop.f32.mrb[59].mxu0 }
 0x421   : > { %v1789_v51 = vadd.f32 %v1788_v49, %v3534_v5  ;;  %2118 = vmax.xlane.f32.xlu0 %v1954_v42  ;;  %v1882_v24 = vmax.f32 %v1785_v40, 0.0 }
 0x422   : > { %v1957_v28 = vmul.f32 %v3540_v13, %v1881_v45  ;;  %v1883_v50 = vmax.f32 %v1787_v48, 0.0  ;;  %2120 = vmax.xlane.f32.xlu1 %v1956_v3 }
 0x423   : > { %v1884_v56 = vmax.f32 %v1789_v51, 0.0  ;;  %v1958_v62 = vmul.f32 %v3547_v32, %v1882_v24 }
 0x424   : > { %v1959_v55 = vmul.f32 %v3540_v13, %v1883_v50 }
 0x425   : > { %v1792_v59 = vpop.f32.mrb[60].mxu0  ;;  %2023 = vmax.xlane.f32.xlu0 %v1957_v28  ;;  %v1960_v63 = vmul.f32 %v3547_v32, %v1884_v56 }
 0x426   : > { %v1793_v36 = vadd.f32 %v1792_v59, %v3542_v16  ;;  %v1794_v61 = vpop.f32.mrb[61].mxu0  ;;  %2025 = vmax.xlane.f32.xlu1 %v1959_v55 }
 0x427   : > { %v1795_v26 = vadd.f32 %v1794_v61, %v3542_v16  ;;  %v1796_v5 = vpop.f32.mrb[62].mxu0 }
 0x428   : > { %v1885_v35 = vmax.f32 %v1793_v36, 0.0  ;;  %v1797_v6 = vadd.f32 %v1796_v5, %v3544_v30  ;;  %v1798_v9 = vpop.f32.mrb[63].mxu0 }
 0x429   : > { %v1799_v11 = vadd.f32 %v1798_v9, %v3544_v30  ;;  %2122 = vmax.xlane.f32.xlu0 %v1958_v62  ;;  %v1886_v15 = vmax.f32 %v1795_v26, 0.0 }
 0x42a   : > { %v1961_v8 = vmul.f32 %v3540_v13, %v1885_v35  ;;  %v1887_v14 = vmax.f32 %v1797_v6, 0.0  ;;  %2124 = vmax.xlane.f32.xlu1 %v1960_v63 }
 0x42b   : > { %v1888_v21 = vmax.f32 %v1799_v11, 0.0  ;;  %v1962_v27 = vmul.f32 %v3547_v32, %v1886_v15 }
 0x42c   : > { %v1963_v17 = vmul.f32 %v3540_v13, %v1887_v14 }
 0x42d   : > { %v1802_v10 = vpop.f32.mrb[64].mxu0  ;;  %2027 = vmax.xlane.f32.xlu0 %v1961_v8  ;;  %v1964_v31 = vmul.f32 %v3547_v32, %v1888_v21 }
 0x42e   : > { %v1803_v16 = vadd.f32 %v1802_v10, %v3554_v54  ;;  %v1804_v25 = vpop.f32.mrb[65].mxu0  ;;  %2029 = vmax.xlane.f32.xlu1 %v1963_v17 }
 0x42f   : > { %v1805_v29 = vadd.f32 %v1804_v25, %v3554_v54  ;;  %v1806_v30 = vpop.f32.mrb[66].mxu0 }
 0x430   : > { %v1889_v4 = vmax.f32 %v1803_v16, 0.0  ;;  %v1807_v46 = vadd.f32 %v1806_v30, %v3557_v12  ;;  %v1808_v60 = vpop.f32.mrb[67].mxu0 }
 0x431   : > { %v1809_v34 = vadd.f32 %v1808_v60, %v3557_v12  ;;  %2126 = vmax.xlane.f32.xlu0 %v1962_v27  ;;  %v1890_v18 = vmax.f32 %v1805_v29, 0.0 }
 0x432   : > { %v1965_v38 = vmul.f32 %v3540_v13, %v1889_v4  ;;  %v1891_v22 = vmax.f32 %v1807_v46, 0.0  ;;  %2128 = vmax.xlane.f32.xlu1 %v1964_v31  ;;  %v1755_v31 = vadd.f32 %v3595_v58, %v3591_v43  ;;  %v1982_v58 = vand.u32 127, %v519_v57 }
 0x433   : > { %v1892_v41 = vmax.f32 %v1809_v34, 0.0  ;;  %v1966_v1 = vmul.f32 %v3547_v32, %v1890_v18 }
 0x434   : > { %v1967_v39 = vmul.f32 %v3540_v13, %v1891_v22  ;;  %v1870_v34 = vmax.f32 %v1755_v31, 0.0  ;;  %vm2047_vm1 = vcmp.eq.s32.totalorder %v1982_v58, 0  ;;  %vm2146_vm2 = vcmp.eq.s32.totalorder %v1982_v58, 1  ;;  %v2257_v31 = vld [vmem:[%s3953_s11 + $0x60] sm:$0xff] }
 0x435   : > { %v1812_v19 = vpop.f32.mrb[68].mxu0  ;;  %2031 = vmax.xlane.f32.xlu0 %v1965_v38  ;;  %v1968_v42 = vmul.f32 %v3547_v32, %v1892_v41 }
 0x436   : > { %v1813_v54 = vadd.f32 %v1812_v19, %v3564_v20  ;;  %v1814_v2 = vpop.f32.mrb[69].mxu0  ;;  %2033 = vmax.xlane.f32.xlu1 %v1967_v39  ;;  %v1946_v18 = vmul.f32 %v3547_v32, %v1870_v34 }
 0x437   : > { %v1815_v7 = vadd.f32 %v1814_v2, %v3564_v20  ;;  %v1816_v12 = vpop.f32.mrb[70].mxu0 }
 0x438   : > { %v1893_v40 = vmax.f32 %v1813_v54, 0.0  ;;  %v1817_v44 = vadd.f32 %v1816_v12, %v3567_v33  ;;  %v1818_v3 = vpop.f32.mrb[71].mxu0 }
 0x439   : > { %v1819_v45 = vadd.f32 %v1818_v3, %v3567_v33  ;;  %2130 = vmax.xlane.f32.xlu0 %v1966_v1  ;;  %v1894_v51 = vmax.f32 %v1815_v7, 0.0 }
 0x43a   : > { %v1969_v48 = vmul.f32 %v3540_v13, %v1893_v40  ;;  %v1895_v49 = vmax.f32 %v1817_v44, 0.0  ;;  %2132 = vmax.xlane.f32.xlu1 %v1968_v42  ;;  %v2247_v42 = vld [vmem:[%s3953_s11 + $0x10] sm:$0xff]  ;;  %v2245_v40 = vld [vmem:[%s3953_s11] sm:$0xff] }
 0x43b   : > { %v1896_v50 = vmax.f32 %v1819_v45, 0.0  ;;  %v1970_v56 = vmul.f32 %v3547_v32, %v1894_v51 }
 0x43c   : > { %v1971_v28 = vmul.f32 %v3540_v13, %v1895_v49 }
 0x43d   : > { %v1822_v24 = vpop.f32.mrb[72].mxu0  ;;  %2035 = vmax.xlane.f32.xlu0 %v1969_v48  ;;  %v1972_v36 = vmul.f32 %v3547_v32, %v1896_v50  ;;  %v2915_v48 = vld [vmem:[%s3952_s10 + $0x4] ss:$8 sps:$4 sm:$0xff]  }
 0x43e   : > { %v1823_v20 = vadd.f32 %v1822_v24, %v3574_v52  ;;  %v1824_v55 = vpop.f32.mrb[73].mxu0  ;;  %2037 = vmax.xlane.f32.xlu1 %v1971_v28  ;;  %v2249_v50 = vld [vmem:[%s3953_s11 + $0x20] sm:$0xff]  ;;  %v2248_v24 = vld [vmem:[%s3953_s11 + $0x18] sm:$0xff]  ;;  %2453 = vmatprep.mubr.bf16.mxu1 %v2915_v48 }
 0x43f   : > { %v1825_v59 = vadd.f32 %v1824_v55, %v3574_v52  ;;  %v1826_v33 = vpop.f32.mrb[74].mxu0 }
 0x440   : > { %v1897_v61 = vmax.f32 %v1823_v20, 0.0  ;;  %v1827_v62 = vadd.f32 %v1826_v33, %v3577_v23  ;;  %v1828_v26 = vpop.f32.mrb[75].mxu0 }
 0x441   : > { %v1829_v5 = vadd.f32 %v1828_v26, %v3577_v23  ;;  %2134 = vmax.xlane.f32.xlu0 %v1970_v56  ;;  %v1898_v6 = vmax.f32 %v1825_v59, 0.0 }
 0x442   : > { %v1973_v63 = vmul.f32 %v3540_v13, %v1897_v61  ;;  %v1899_v35 = vmax.f32 %v1827_v62, 0.0  ;;  %2136 = vmax.xlane.f32.xlu1 %v1972_v36  ;;  %v2251_v36 = vld [vmem:[%s3953_s11 + $0x30] sm:$0xff]  ;;  %v2250_v61 = vld [vmem:[%s3953_s11 + $0x28] sm:$0xff] }
 0x443   : > { %v1900_v11 = vmax.f32 %v1829_v5, 0.0  ;;  %v1974_v15 = vmul.f32 %v3547_v32, %v1898_v6 }
 0x444   : > { %v1975_v9 = vmul.f32 %v3540_v13, %v1899_v35 }
 0x445   : > { %v1832_v8 = vpop.f32.mrb[76].mxu0  ;;  %2039 = vmax.xlane.f32.xlu0 %v1973_v63  ;;  %v1976_v21 = vmul.f32 %v3547_v32, %v1900_v11  ;;  %v2252_v11 = vld [vmem:[%s3953_s11 + $0x38] sm:$0xff] }
 0x446   : > { %v1833_v52 = vadd.f32 %v1832_v8, %v3584_v0  ;;  %v1834_v14 = vpop.f32.mrb[77].mxu0  ;;  %2041 = vmax.xlane.f32.xlu1 %v1975_v9  ;;  %v2253_v9 = vld [vmem:[%s3953_s11 + $0x40] sm:$0xff] }
 0x447   : > { %v1835_v17 = vadd.f32 %v1834_v14, %v3584_v0  ;;  %v1836_v23 = vpop.f32.mrb[78].mxu0  ;;  %v1759_v0 = vadd.f32 %v3601_v53, %v3597_v47 }
 0x448   : > { %v1901_v10 = vmax.f32 %v1833_v52, 0.0  ;;  %v1837_v16 = vadd.f32 %v1836_v23, %v3587_v37  ;;  %v1838_v25 = vpop.f32.mrb[79].mxu0  ;;  %v2255_v23 = vld [vmem:[%s3953_s11 + $0x50] sm:$0xff] }
 0x449   : > { %v1839_v27 = vadd.f32 %v1838_v25, %v3587_v37  ;;  %2138 = vmax.xlane.f32.xlu0 %v1974_v15  ;;  %v1902_v4 = vmax.f32 %v1835_v17, 0.0  ;;  %v1872_v38 = vmax.f32 %v1759_v0, 0.0 }
 0x44a   : > { %v1977_v29 = vmul.f32 %v3540_v13, %v1901_v10  ;;  %v1903_v30 = vmax.f32 %v1837_v16, 0.0  ;;  %2140 = vmax.xlane.f32.xlu1 %v1976_v21  ;;  %v2254_v21 = vld [vmem:[%s3953_s11 + $0x48] sm:$0xff] }
 0x44b   : > { %v1904_v60 = vmax.f32 %v1839_v27, 0.0  ;;  %v1978_v37 = vmul.f32 %v3547_v32, %v1902_v4  ;;  %v1948_v43 = vmul.f32 %v3547_v32, %v1872_v38  ;;  %v2256_v4 = vld [vmem:[%s3953_s11 + $0x58] sm:$0xff]  ;;  %v2259_v38 = vld [vmem:[%s3953_s11 + $0x70] sm:$0xff] }
 0x44c   : > { %v1979_v46 = vmul.f32 %v3540_v13, %v1903_v30  ;;  %v2955_v13 = vmov 0.0  }
 0x44d   : > { %2043 = vmax.xlane.f32.xlu0 %v1977_v29  ;;  %v1980_v22 = vmul.f32 %v3547_v32, %v1904_v60  ;;  %v3677_v47 = vsel %vm2047_vm1, 1.0, %v2955_v13  ;;  %v3681_v41 = vsel %vm2146_vm2, 1.0, %v2955_v13  ;;  %v2246_v32 = vld [vmem:[%s3953_s11 + $0x8] sm:$0xff] }
 0x44e   : > { %2045 = vmax.xlane.f32.xlu1 %v1979_v46 }
 0x451   : > { %2142 = vmax.xlane.f32.xlu0 %v1978_v37 }
 0x452   : > { %2144 = vmax.xlane.f32.xlu1 %v1980_v22  ;;  %v2258_v22 = vld [vmem:[%s3953_s11 + $0x68] sm:$0xff] }
 0x455   : > { %2110 = vmax.xlane.f32.xlu0 %v1946_v18 }
 0x456   : > { %2112 = vmax.xlane.f32.xlu1 %v1948_v43 }
 0x461   : > { %v1984_v53 = vpop.xlane.xlu0 %1983 }
 0x462   : > { %v2050_v39 = vmul.f32 %v3677_v47, %v1984_v53 }
 0x463   : > { %v1986_v19 = vpop.xlane.xlu1 %1985 }
 0x464   : > { %v2051_v54 = vmul.f32 %v3677_v47, %v1986_v19 }
 0x465   : > { %v2083_v57 = vpop.xlane.xlu0 %2082 }
 0x466   : > { %v2149_v2 = vmul.f32 %v3681_v41, %v2083_v57 }
 0x467   : > { %2268 = vperm.xlu1 %2884, %v2246_v32   ;;  %v2085_v1 = vpop.xlane.xlu1 %2084  ;;  %v2260_v32 = vld [vmem:[%s3953_s11 + $0x78] sm:$0xff] }
 0x468   : > { %v3688_v7 = vadd.f32 %v2149_v2, %v2050_v39  ;;  %v2150_v12 = vmul.f32 %v3681_v41, %v2085_v1 }
 0x469   : > { %v1988_v44 = vpop.xlane.xlu0 %1987 }
 0x46a   : > { %v3697_v3 = vadd.f32 %v2150_v12, %v2051_v54  ;;  %v2052_v45 = vmul.f32 %v3677_v47, %v1988_v44  ;;  %v2544_v54 = vld [vmem:[%s3955_s13] sm:$0xff] }
 0x46b   : > { %2273 = vperm.xlu1 %2884, %v2247_v42   ;;  %v1990_v49 = vpop.xlane.xlu1 %1989  ;;  %2263 = vperm.xlu0 %2882, %v2245_v40   ;;  %v2545_v40 = vld [vmem:[%s3955_s13 + $0x8] sm:$0x3] }
 0x46c   : > { %v2213_v51 = vpack.c.bf16 %v3697_v3, %v3688_v7  ;;  %v2053_v28 = vmul.f32 %v3677_v47, %v1990_v49 }
 0x46d   : > { %v2087_v20 = vpop.xlane.xlu0 %2086 }
 0x46e   : > { %v2151_v55 = vmul.f32 %v3681_v41, %v2087_v20 }
 0x46f   : > { %2283 = vperm.xlu1 %2884, %v2249_v50   ;;  %v2089_v56 = vpop.xlane.xlu1 %2088  ;;  %2278 = vperm.xlu0 %2882, %v2248_v24  }
 0x470   : > { %v3713_v59 = vadd.f32 %v2151_v55, %v2052_v45  ;;  %v2152_v33 = vmul.f32 %v3681_v41, %v2089_v56 }
 0x471   : > { %v1992_v62 = vpop.xlane.xlu0 %1991 }
 0x472   : > { %v3722_v26 = vadd.f32 %v2152_v33, %v2053_v28  ;;  %v2054_v5 = vmul.f32 %v3677_v47, %v1992_v62 }
 0x473   : > { %2293 = vperm.xlu1 %2884, %v2251_v36   ;;  %v1994_v63 = vpop.xlane.xlu1 %1993  ;;  %2288 = vperm.xlu0 %2882, %v2250_v61  }
 0x474   : > { %v2214_v35 = vpack.c.bf16 %v3722_v26, %v3713_v59  ;;  %v2055_v6 = vmul.f32 %v3677_v47, %v1994_v63 }
 0x475   : > { %v2091_v8 = vpop.xlane.xlu0 %2090 }
 0x476   : > { %v2153_v52 = vmul.f32 %v3681_v41, %v2091_v8 }
 0x477   : > { %2303 = vperm.xlu1 %2884, %v2253_v9   ;;  %v2093_v14 = vpop.xlane.xlu1 %2092  ;;  %2298 = vperm.xlu0 %2882, %v2252_v11  }
 0x478   : > { %v3735_v15 = vadd.f32 %v2153_v52, %v2054_v5  ;;  %v2154_v17 = vmul.f32 %v3681_v41, %v2093_v14 }
 0x479   : > { %v1996_v10 = vpop.xlane.xlu0 %1995 }
 0x47a   : > { %v3744_v16 = vadd.f32 %v2154_v17, %v2055_v6  ;;  %v2056_v25 = vmul.f32 %v3677_v47, %v1996_v10 }
 0x47b   : > { %2313 = vperm.xlu1 %2884, %v2255_v23   ;;  %v1998_v27 = vpop.xlane.xlu1 %1997  ;;  %2308 = vperm.xlu0 %2882, %v2254_v21  }
 0x47c   : > { %v2215_v29 = vpack.c.bf16 %v3744_v16, %v3735_v15  ;;  %v2057_v30 = vmul.f32 %v3677_v47, %v1998_v27 }
 0x47d   : > { %v2095_v0 = vpop.xlane.xlu0 %2094 }
 0x47e   : > { %v2155_v46 = vmul.f32 %v3681_v41, %v2095_v0 }
 0x47f   : > { %2323 = vperm.xlu1 %2884, %v2257_v31   ;;  %v2097_v60 = vpop.xlane.xlu1 %2096  ;;  %2318 = vperm.xlu0 %2882, %v2256_v4  }
 0x480   : > { %v3757_v34 = vadd.f32 %v2155_v46, %v2056_v25  ;;  %v2156_v37 = vmul.f32 %v3681_v41, %v2097_v60 }
 0x481   : > { %v2000_v18 = vpop.xlane.xlu0 %1999 }
 0x482   : > { %v3766_v43 = vadd.f32 %v2156_v37, %v2057_v30  ;;  %v2058_v58 = vmul.f32 %v3677_v47, %v2000_v18 }
 0x483   : > { %2333 = vperm.xlu1 %2884, %v2259_v38   ;;  %v2002_v53 = vpop.xlane.xlu1 %2001  ;;  %2328 = vperm.xlu0 %2882, %v2258_v22  }
 0x484   : > { %v2216_v39 = vpack.c.bf16 %v3766_v43, %v3757_v34  ;;  %v2059_v19 = vmul.f32 %v3677_v47, %v2002_v53 }
 0x485   : > { %v2099_v57 = vpop.xlane.xlu0 %2098 }
 0x486   : > { %v2157_v2 = vmul.f32 %v3681_v41, %v2099_v57 }
 0x487   : > { %2548 = vperm.xlu1 %2884, %v2544_v54   ;;  %v2101_v1 = vpop.xlane.xlu1 %2100  ;;  %2338 = vperm.xlu0 %2882, %v2260_v32  }
 0x488   : > { %v3779_v12 = vadd.f32 %v2157_v2, %v2058_v58  ;;  %v2158_v42 = vmul.f32 %v3681_v41, %v2101_v1 }
 0x489   : > { %v2004_v44 = vpop.xlane.xlu0 %2003 }
 0x48a   : > { %v3785_v45 = vadd.f32 %v2158_v42, %v2059_v19  ;;  %v2060_v48 = vmul.f32 %v3677_v47, %v2004_v44 }
 0x48b   : > { %v2006_v49 = vpop.xlane.xlu1 %2005  ;;  %2553 = vperm.xlu0 %2882, %v2545_v40  }
 0x48c   : > { %v2217_v28 = vpack.c.bf16 %v3785_v45, %v3779_v12  ;;  %v2061_v50 = vmul.f32 %v3677_v47, %v2006_v49 }
 0x48d   : > { %v2103_v24 = vpop.xlane.xlu0 %2102 }
 0x48e   : > { %v2159_v20 = vmul.f32 %v3681_v41, %v2103_v24 }
 0x48f   : > { %v2105_v55 = vpop.xlane.xlu1 %2104 }
 0x490   : > { %v3792_v56 = vadd.f32 %v2159_v20, %v2060_v48  ;;  %v2160_v33 = vmul.f32 %v3681_v41, %v2105_v55 }
 0x491   : > { %v2008_v36 = vpop.xlane.xlu0 %2007 }
 0x492   : > { %v3795_v61 = vadd.f32 %v2160_v33, %v2061_v50  ;;  %v2062_v62 = vmul.f32 %v3677_v47, %v2008_v36 }
 0x493   : > { %v2010_v5 = vpop.xlane.xlu1 %2009 }
 0x494   : > { %v2218_v63 = vpack.c.bf16 %v3795_v61, %v3792_v56  ;;  %v2063_v6 = vmul.f32 %v3677_v47, %v2010_v5 }
 0x495   : > { %v2107_v9 = vpop.xlane.xlu0 %2106 }
 0x496   : > { %v2161_v11 = vmul.f32 %v3681_v41, %v2107_v9 }
 0x497   : > { %v2109_v8 = vpop.xlane.xlu1 %2108 }
 0x498   : > { %v3802_v52 = vadd.f32 %v2161_v11, %v2062_v62  ;;  %v2162_v14 = vmul.f32 %v3681_v41, %v2109_v8 }
 0x499   : > { %v2012_v17 = vpop.xlane.xlu0 %2011 }
 0x49a   : > { %v3805_v23 = vadd.f32 %v2162_v14, %v2063_v6  ;;  %v3808_v21 = vmul.f32 %v3677_v47, %v2012_v17 }
 0x49b   : > { %v2014_v10 = vpop.xlane.xlu1 %2013 }
 0x49c   : > { %v2219_v25 = vpack.c.bf16 %v3805_v23, %v3802_v52  ;;  %v3813_v27 = vmul.f32 %v3677_v47, %v2014_v10  ;;  %v2916_v23 = vld [vmem:[%s3952_s10 + $0x14] ss:$8 sps:$4 sm:$0xff]  }
 0x4a1   : > { %v2016_v30 = vpop.xlane.xlu1 %2015 }
 0x4a2   : > { %v2115_v31 = vpop.xlane.xlu0 %2114  ;;  %v2066_v4 = vmul.f32 %v3677_v47, %v2016_v30 }
 0x4a3   : > { %v2165_v0 = vmul.f32 %v3681_v41, %v2115_v31 }
 0x4a5   : > { %v2117_v46 = vpop.xlane.xlu1 %2116  ;;  %v2197_v22 = vadd.f32 %v2165_v0, %v2066_v4 }
 0x4a6   : > { %v2166_v60 = vmul.f32 %v3681_v41, %v2117_v46  ;;  %v2018_v37 = vpop.xlane.xlu0 %2017 }
 0x4a7   : > { %v2067_v38 = vmul.f32 %v3677_v47, %v2018_v37 }
 0x4a9   : > { %v2198_v18 = vadd.f32 %v2166_v60, %v2067_v38 }
 0x4aa   : > { %v2020_v58 = vpop.xlane.xlu0 %2019 }
 0x4ab   : > { %v2022_v53 = vpop.xlane.xlu1 %2021  ;;  %v2221_v19 = vpack.c.bf16 %v2198_v18, %v2197_v22  ;;  %v2068_v32 = vmul.f32 %v3677_v47, %v2020_v58 }
 0x4ac   : > { %v2069_v1 = vmul.f32 %v3677_v47, %v2022_v53 }
 0x4ad   : > { %2764 = vmatprep.subr.bf16.mxu1 %v2221_v19 }
 0x4ae   : > { %2765 = vmatpush3.bf16.msra.mxu1 %v2213_v51  ;;  %v2119_v54 = vpop.xlane.xlu0 %2118 }
 0x4af   : > { %v2167_v57 = vmul.f32 %v3681_v41, %v2119_v54  ;;  %v2121_v2 = vpop.xlane.xlu1 %2120 }
 0x4b0   : > { %v2168_v42 = vmul.f32 %v3681_v41, %v2121_v2 }
 0x4b1   : > { %v2199_v40 = vadd.f32 %v2167_v57, %v2068_v32 }
 0x4b2   : > { %v2200_v44 = vadd.f32 %v2168_v42, %v2069_v1  ;;  %v2024_v48 = vpop.xlane.xlu0 %2023 }
 0x4b3   : > { %v2026_v49 = vpop.xlane.xlu1 %2025  ;;  %v2070_v7 = vmul.f32 %v3677_v47, %v2024_v48 }
 0x4b4   : > { %v2222_v50 = vpack.c.bf16 %v2200_v44, %v2199_v40  ;;  %v2071_v20 = vmul.f32 %v3677_v47, %v2026_v49 }
 0x4b6   : > { %2766 = vmatprep.subr.bf16.mxu1 %v2222_v50  ;;  %v2123_v24 = vpop.xlane.xlu0 %2122 }
 0x4b7   : > { %v2169_v3 = vmul.f32 %v3681_v41, %v2123_v24  ;;  %v2125_v51 = vpop.xlane.xlu1 %2124  ;;  %2767 = vmatpush3.bf16.msra.mxu1 %v2214_v35 }
 0x4b8   : > { %v2170_v55 = vmul.f32 %v3681_v41, %v2125_v51 }
 0x4b9   : > { %v2201_v33 = vadd.f32 %v2169_v3, %v2070_v7 }
 0x4ba   : > { %v2202_v36 = vadd.f32 %v2170_v55, %v2071_v20  ;;  %v2028_v62 = vpop.xlane.xlu0 %2027 }
 0x4bb   : > { %v2030_v5 = vpop.xlane.xlu1 %2029  ;;  %v2072_v11 = vmul.f32 %v3677_v47, %v2028_v62 }
 0x4bc   : > { %v2223_v6 = vpack.c.bf16 %v2202_v36, %v2201_v33  ;;  %v2073_v59 = vmul.f32 %v3677_v47, %v2030_v5 }
 0x4be   : > { %2768 = vmatprep.subr.bf16.mxu1 %v2223_v6  ;;  %v2127_v9 = vpop.xlane.xlu0 %2126 }
 0x4bf   : > { %v2171_v8 = vmul.f32 %v3681_v41, %v2127_v9  ;;  %v2129_v14 = vpop.xlane.xlu1 %2128  ;;  %2769 = vmatpush3.bf16.msra.mxu1 %v2215_v29 }
 0x4c0   : > { %v2172_v26 = vmul.f32 %v3681_v41, %v2129_v14  ;;  %v2924_v14 = vld [vmem:[%s3952_s10 + $0x30] ss:$8 sps:$4 sm:$0xff]  }
 0x4c1   : > { %v2203_v35 = vadd.f32 %v2171_v8, %v2072_v11 }
 0x4c2   : > { %v2204_v17 = vadd.f32 %v2172_v26, %v2073_v59  ;;  %v2032_v10 = vpop.xlane.xlu0 %2031  ;;  %v2925_v59 = vld [vmem:[%s3952_s10 + $0x44] ss:$8 sps:$4 sm:$0xff]   ;;  %v2927_v26 = vld [vmem:[%s3952_s10 + $0x40] ss:$8 sps:$4 sm:$0xff]  }
 0x4c3   : > { %v2034_v30 = vpop.xlane.xlu1 %2033  ;;  %v2074_v0 = vmul.f32 %v3677_v47, %v2032_v10  ;;  %v2931_v10 = vld [vmem:[%s3952_s10 + $0x64] ss:$8 sps:$4 sm:$0xff]  }
 0x4c4   : > { %v2224_v31 = vpack.c.bf16 %v2204_v17, %v2203_v35  ;;  %v2075_v15 = vmul.f32 %v3677_v47, %v2034_v30  ;;  %v2928_v35 = vld [vmem:[%s3952_s10 + $0x54] ss:$8 sps:$4 sm:$0xff]   ;;  %v2930_v17 = vld [vmem:[%s3952_s10 + $0x50] ss:$8 sps:$4 sm:$0xff]   ;;  %v2933_v30 = vld [vmem:[%s3952_s10 + $0x60] ss:$8 sps:$4 sm:$0xff]  }
 0x4c6   : > { %2770 = vmatprep.subr.bf16.mxu1 %v2224_v31  ;;  %v2131_v4 = vpop.xlane.xlu0 %2130  ;;  %v2934_v31 = vld [vmem:[%s3952_s10 + $0x74] ss:$8 sps:$4 sm:$0xff]  }
 0x4c7   : > { %v2173_v46 = vmul.f32 %v3681_v41, %v2131_v4  ;;  %v2133_v60 = vpop.xlane.xlu1 %2132  ;;  %2771 = vmatpush3.bf16.msra.mxu1 %v2216_v39  ;;  %v2936_v4 = vld [vmem:[%s3952_s10 + $0x70] ss:$8 sps:$4 sm:$0xff]  }
 0x4c8   : > { %v2174_v16 = vmul.f32 %v3681_v41, %v2133_v60 }
 0x4c9   : > { %v2205_v29 = vadd.f32 %v2173_v46, %v2074_v0 }
 0x4ca   : > { %v2206_v37 = vadd.f32 %v2174_v16, %v2075_v15  ;;  %v2036_v38 = vpop.xlane.xlu0 %2035 }
 0x4cb   : > { %v2038_v22 = vpop.xlane.xlu1 %2037  ;;  %v2076_v53 = vmul.f32 %v3677_v47, %v2036_v38 }
 0x4cc   : > { %v2225_v18 = vpack.c.bf16 %v2206_v37, %v2205_v29  ;;  %v2077_v34 = vmul.f32 %v3677_v47, %v2038_v22 }
 0x4ce   : > { %2772 = vmatprep.subr.bf16.mxu1 %v2225_v18  ;;  %v2135_v58 = vpop.xlane.xlu0 %2134 }
 0x4cf   : > { %v2175_v19 = vmul.f32 %v3681_v41, %v2135_v58  ;;  %v2137_v54 = vpop.xlane.xlu1 %2136  ;;  %2773 = vmatpush3.bf16.msra.mxu1 %v2217_v28 }
 0x4d0   : > { %v2176_v43 = vmul.f32 %v3681_v41, %v2137_v54 }
 0x4d1   : > { %v2207_v39 = vadd.f32 %v2175_v19, %v2076_v53 }
 0x4d2   : > { %v2208_v32 = vadd.f32 %v2176_v43, %v2077_v34  ;;  %v2040_v57 = vpop.xlane.xlu0 %2039 }
 0x4d3   : > { %v2042_v2 = vpop.xlane.xlu1 %2041  ;;  %v2078_v40 = vmul.f32 %v3677_v47, %v2040_v57 }
 0x4d4   : > { %v2226_v1 = vpack.c.bf16 %v2208_v32, %v2207_v39  ;;  %v2079_v12 = vmul.f32 %v3677_v47, %v2042_v2 }
 0x4d6   : > { %2774 = vmatprep.subr.bf16.mxu1 %v2226_v1  ;;  %v2139_v42 = vpop.xlane.xlu0 %2138 }
 0x4d7   : > { %v2177_v44 = vmul.f32 %v3681_v41, %v2139_v42  ;;  %v2141_v48 = vpop.xlane.xlu1 %2140  ;;  %2775 = vmatpush3.bf16.msra.mxu1 %v2218_v63 }
 0x4d8   : > { %v2178_v45 = vmul.f32 %v3681_v41, %v2141_v48 }
 0x4d9   : > { %v2209_v28 = vadd.f32 %v2177_v44, %v2078_v40 }
 0x4da   : > { %v2210_v49 = vadd.f32 %v2178_v45, %v2079_v12  ;;  %v2044_v50 = vpop.xlane.xlu0 %2043 }
 0x4db   : > { %v2046_v24 = vpop.xlane.xlu1 %2045  ;;  %v2080_v51 = vmul.f32 %v3677_v47, %v2044_v50 }
 0x4dc   : > { %v2227_v7 = vpack.c.bf16 %v2210_v49, %v2209_v28  ;;  %v2081_v56 = vmul.f32 %v3677_v47, %v2046_v24  ;;  %v2913_v47 = vld [vmem:[%s3952_s10] ss:$8 sps:$4 sm:$0xff]  }
 0x4de   : > { %2776 = vmatprep.subr.bf16.mxu1 %v2227_v7  ;;  %v2143_v3 = vpop.xlane.xlu0 %2142 }
 0x4df   : > { %v2179_v20 = vmul.f32 %v3681_v41, %v2143_v3  ;;  %v2145_v55 = vpop.xlane.xlu1 %2144  ;;  %2777 = vmatpush3.bf16.msra.mxu1 %v2219_v25  ;;  %v2921_v25 = vld [vmem:[%s3952_s10 + $0x20] ss:$8 sps:$4 sm:$0xff]  }
 0x4e0   : > { %v2180_v61 = vmul.f32 %v3681_v41, %v2145_v55 }
 0x4e1   : > { %v2211_v63 = vadd.f32 %v2179_v20, %v2080_v51 }
 0x4e2   : > { %v2212_v33 = vadd.f32 %v2180_v61, %v2081_v56  ;;  %v2111_v36 = vpop.xlane.xlu0 %2110 }
 0x4e3   : > { %v2163_v62 = vmul.f32 %v3681_v41, %v2111_v36  ;;  %v2113_v5 = vpop.xlane.xlu1 %2112 }
 0x4e4   : > { %v2164_v6 = vmul.f32 %v3681_v41, %v2113_v5  ;;  %v2228_v9 = vpack.c.bf16 %v2212_v33, %v2211_v63  ;;  %v2918_v41 = vld [vmem:[%s3952_s10 + $0x10] ss:$8 sps:$4 sm:$0xff]  }
 0x4e5   : > { %v2195_v11 = vadd.f32 %v2163_v62, %v3808_v21  ;;  %v2919_v21 = vld [vmem:[%s3952_s10 + $0x24] ss:$8 sps:$4 sm:$0xff]  }
 0x4e6   : > { %v2196_v8 = vadd.f32 %v2164_v6, %v3813_v27  ;;  %2778 = vmatprep.subr.bf16.mxu1 %v2228_v9  ;;  %v2922_v27 = vld [vmem:[%s3952_s10 + $0x34] ss:$8 sps:$4 sm:$0xff]  }
 0x4e7   : > { %v2269_v22 = vpop.permute.xlu1 %2268 }
 0x4e8   : > { %v2220_v52 = vpack.c.bf16 %v2196_v8, %v2195_v11 }
 0x4ea   : > { %2779 = vmatpush3.bf16.msra.mxu1 %v2220_v52  ;;  %v2264_v16 = vpop.permute.xlu0 %2263 }
 0x4eb   : > { %2837 = vmatprep.subr.bf16.mxu1 %v2955_v13  ;;  %v2274_v32 = vpop.permute.xlu1 %2273 }
 0x4ed   : > { %2454 = vmatmul.mubr.bf16.vlgmr.msra.gmra.mrb[32].mxu1 %v2913_v47 }
 0x4ee   : > { %2461 = vmatprep.mubr.bf16.mxu1 %v2916_v23  ;;  %v2279_v42 = vpop.permute.xlu0 %2278 }
 0x4ef   : > { %v2284_v24 = vpop.permute.xlu1 %2283 }
 0x4f2   : > { %v2289_v20 = vpop.permute.xlu0 %2288 }
 0x4f3   : > { %v2294_v6 = vpop.permute.xlu1 %2293 }
 0x4f5   : > { %2462 = vmatmul.mubr.bf16.gmra.mrb[36].mxu1 %v2918_v41 }
 0x4f6   : > { %2469 = vmatprep.mubr.bf16.mxu1 %v2919_v21  ;;  %v2299_v52 = vpop.permute.xlu0 %2298 }
 0x4fd   : > { %2470 = vmatmul.mubr.bf16.gmra.mrb[40].mxu1 %v2921_v25 }
 0x4fe   : > { %2477 = vmatprep.mubr.bf16.mxu1 %v2922_v27 }
 0x505   : > { %2478 = vmatmul.mubr.bf16.gmra.mrb[44].mxu1 %v2924_v14 }
 0x506   : > { %2485 = vmatprep.mubr.bf16.mxu1 %v2925_v59 }
 0x50d   : > { %2486 = vmatmul.mubr.bf16.gmra.mrb[48].mxu1 %v2927_v26  ;;  %v2304_v26 = vpop.permute.xlu1 %2303 }
 0x50e   : > { %2493 = vmatprep.mubr.bf16.mxu1 %v2928_v35 }
 0x515   : > { %2494 = vmatmul.mubr.bf16.gmra.mrb[52].mxu1 %v2930_v17 }
 0x516   : > { %2501 = vmatprep.mubr.bf16.mxu1 %v2931_v10 }
 0x51d   : > { %2502 = vmatmul.mubr.bf16.gmra.mrb[56].mxu1 %v2933_v30  ;;  %v2309_v30 = vpop.permute.xlu0 %2308 }
 0x51e   : > { %2509 = vmatprep.mubr.bf16.mxu1 %v2934_v31 }
 0x525   : > { %2510 = vmatmul.mubr.bf16.gmra.mrb[60].mxu1 %v2936_v4 }
 0x526   : > { %2853 = vmatprep.mubr.msk.bf16.mxu1 %vm2956_vm3, %v2955_v13 }
 0x5c0   : > { %v2780_v0 = vpop.f32.mrb[32].mxu1 }
 0x5c1   : > { %v2781_v46 = vpop.f32.mrb[33].mxu1 }
 0x5c2   : > { %v2782_v60 = vadd.f32 %v2781_v46, %v2780_v0  ;;  %v2783_v15 = vpop.f32.mrb[34].mxu1 }
 0x5c3   : > { %v2784_v29 = vpop.f32.mrb[35].mxu1 }
 0x5c4   : > { %v2456_v37 = vadd.f32 %v2782_v60, %v2264_v16  ;;  %v2785_v38 = vadd.f32 %v2784_v29, %v2783_v15 }
 0x5c6   : > { %v2459_v18 = vadd.f32 %v2785_v38, %v2269_v22  ;;  %v2518_v58 = vmax.f32 %v2456_v37, 0.0  ;;  %v2314_v37 = vpop.permute.xlu1 %2313 }
 0x5c8   : > { %v2519_v53 = vmax.f32 %v2459_v18, 0.0  ;;  %v2786_v19 = vpop.f32.mrb[36].mxu1 }
 0x5c9   : > { %v2787_v54 = vpop.f32.mrb[37].mxu1 }
 0x5ca   : > { %v2534_v34 = vpack.c.bf16 %v2519_v53, %v2518_v58  ;;  %v2788_v43 = vadd.f32 %v2787_v54, %v2786_v19  ;;  %v2789_v39 = vpop.f32.mrb[38].mxu1  ;;  %v2319_v58 = vpop.permute.xlu0 %2318 }
 0x5cb   : > { %v2790_v57 = vpop.f32.mrb[39].mxu1 }
 0x5cc   : > { %v2464_v2 = vadd.f32 %v2788_v43, %v2274_v32  ;;  %v2791_v1 = vadd.f32 %v2790_v57, %v2789_v39  ;;  %2838 = vmatpush3.bf16.msra.mxu1 %v2534_v34 }
 0x5cd   : > { %2839 = vmatprep.subr.bf16.mxu1 %v2955_v13 }
 0x5ce   : > { %v2467_v40 = vadd.f32 %v2791_v1, %v2279_v42  ;;  %v2520_v44 = vmax.f32 %v2464_v2, 0.0  ;;  %v2324_v2 = vpop.permute.xlu1 %2323 }
 0x5d0   : > { %v2521_v48 = vmax.f32 %v2467_v40, 0.0  ;;  %v2792_v12 = vpop.f32.mrb[40].mxu1 }
 0x5d1   : > { %v2793_v45 = vpop.f32.mrb[41].mxu1 }
 0x5d2   : > { %v2535_v28 = vpack.c.bf16 %v2521_v48, %v2520_v44  ;;  %v2794_v49 = vadd.f32 %v2793_v45, %v2792_v12  ;;  %v2795_v50 = vpop.f32.mrb[42].mxu1  ;;  %v2329_v44 = vpop.permute.xlu0 %2328 }
 0x5d3   : > { %v2796_v7 = vpop.f32.mrb[43].mxu1 }
 0x5d4   : > { %v2472_v3 = vadd.f32 %v2794_v49, %v2284_v24  ;;  %v2797_v51 = vadd.f32 %v2796_v7, %v2795_v50  ;;  %2840 = vmatpush3.bf16.msra.mxu1 %v2535_v28 }
 0x5d5   : > { %2841 = vmatprep.subr.bf16.mxu1 %v2955_v13 }
 0x5d6   : > { %v2475_v55 = vadd.f32 %v2797_v51, %v2289_v20  ;;  %v2522_v56 = vmax.f32 %v2472_v3, 0.0  ;;  %v2334_v3 = vpop.permute.xlu1 %2333 }
 0x5d8   : > { %v2523_v61 = vmax.f32 %v2475_v55, 0.0  ;;  %v2798_v63 = vpop.f32.mrb[44].mxu1 }
 0x5d9   : > { %v2799_v33 = vpop.f32.mrb[45].mxu1 }
 0x5da   : > { %v2536_v36 = vpack.c.bf16 %v2523_v61, %v2522_v56  ;;  %v2800_v62 = vadd.f32 %v2799_v33, %v2798_v63  ;;  %v2801_v5 = vpop.f32.mrb[46].mxu1  ;;  %v2339_v56 = vpop.permute.xlu0 %2338 }
 0x5db   : > { %v2802_v9 = vpop.f32.mrb[47].mxu1 }
 0x5dc   : > { %v2480_v11 = vadd.f32 %v2800_v62, %v2294_v6  ;;  %v2803_v8 = vadd.f32 %v2802_v9, %v2801_v5  ;;  %2842 = vmatpush3.bf16.msra.mxu1 %v2536_v36  ;;  %v2937_v62 = vld [vmem:[%s3954_s12] sm:$0x1f]   ;;  %v2549_v5 = vpop.permute.xlu1 %2548 }
 0x5dd   : > { %2843 = vmatprep.subr.bf16.mxu1 %v2955_v13 }
 0x5de   : > { %v2483_v47 = vadd.f32 %v2803_v8, %v2299_v52  ;;  %v2524_v23 = vmax.f32 %v2480_v11, 0.0  ;;  %v2554_v8 = vpop.permute.xlu0 %2553 }
 0x5e0   : > { %v2525_v41 = vmax.f32 %v2483_v47, 0.0  ;;  %v2804_v21 = vpop.f32.mrb[48].mxu1 }
 0x5e1   : > { %v2805_v25 = vpop.f32.mrb[49].mxu1 }
 0x5e2   : > { %v2537_v27 = vpack.c.bf16 %v2525_v41, %v2524_v23  ;;  %v2806_v14 = vadd.f32 %v2805_v25, %v2804_v21  ;;  %v2807_v59 = vpop.f32.mrb[50].mxu1 }
 0x5e3   : > { %v2808_v35 = vpop.f32.mrb[51].mxu1 }
 0x5e4   : > { %v2488_v17 = vadd.f32 %v2806_v14, %v2304_v26  ;;  %v2809_v10 = vadd.f32 %v2808_v35, %v2807_v59  ;;  %2844 = vmatpush3.bf16.msra.mxu1 %v2537_v27 }
 0x5e5   : > { %2845 = vmatprep.subr.bf16.mxu1 %v2955_v13 }
 0x5e6   : > { %v2491_v31 = vadd.f32 %v2809_v10, %v2309_v30  ;;  %v2526_v4 = vmax.f32 %v2488_v17, 0.0 }
 0x5e8   : > { %v2527_v0 = vmax.f32 %v2491_v31, 0.0  ;;  %v2810_v46 = vpop.f32.mrb[52].mxu1 }
 0x5e9   : > { %v2811_v60 = vpop.f32.mrb[53].mxu1 }
 0x5ea   : > { %v2538_v15 = vpack.c.bf16 %v2527_v0, %v2526_v4  ;;  %v2812_v16 = vadd.f32 %v2811_v60, %v2810_v46  ;;  %v2813_v29 = vpop.f32.mrb[54].mxu1 }
 0x5eb   : > { %v2814_v38 = vpop.f32.mrb[55].mxu1 }
 0x5ec   : > { %v2496_v22 = vadd.f32 %v2812_v16, %v2314_v37  ;;  %v2815_v18 = vadd.f32 %v2814_v38, %v2813_v29  ;;  %2846 = vmatpush3.bf16.msra.mxu1 %v2538_v15 }
 0x5ed   : > { %2847 = vmatprep.subr.bf16.mxu1 %v2955_v13 }
 0x5ee   : > { %v2499_v53 = vadd.f32 %v2815_v18, %v2319_v58  ;;  %v2528_v19 = vmax.f32 %v2496_v22, 0.0 }
 0x5f0   : > { %v2529_v54 = vmax.f32 %v2499_v53, 0.0  ;;  %v2816_v34 = vpop.f32.mrb[56].mxu1 }
 0x5f1   : > { %v2817_v43 = vpop.f32.mrb[57].mxu1 }
 0x5f2   : > { %v2539_v39 = vpack.c.bf16 %v2529_v54, %v2528_v19  ;;  %v2818_v32 = vadd.f32 %v2817_v43, %v2816_v34  ;;  %v2819_v57 = vpop.f32.mrb[58].mxu1 }
 0x5f3   : > { %v2820_v1 = vpop.f32.mrb[59].mxu1 }
 0x5f4   : > { %v2504_v42 = vadd.f32 %v2818_v32, %v2324_v2  ;;  %v2821_v40 = vadd.f32 %v2820_v1, %v2819_v57  ;;  %2848 = vmatpush3.bf16.msra.mxu1 %v2539_v39 }
 0x5f5   : > { %2849 = vmatprep.subr.bf16.mxu1 %v2955_v13 }
 0x5f6   : > { %v2507_v48 = vadd.f32 %v2821_v40, %v2329_v44  ;;  %v2530_v12 = vmax.f32 %v2504_v42, 0.0 }
 0x5f8   : > { %v2531_v45 = vmax.f32 %v2507_v48, 0.0  ;;  %v2822_v28 = vpop.f32.mrb[60].mxu1 }
 0x5f9   : > { %v2823_v49 = vpop.f32.mrb[61].mxu1 }
 0x5fa   : > { %v2540_v50 = vpack.c.bf16 %v2531_v45, %v2530_v12  ;;  %v2824_v24 = vadd.f32 %v2823_v49, %v2822_v28  ;;  %v2825_v7 = vpop.f32.mrb[62].mxu1 }
 0x5fb   : > { %v2826_v51 = vpop.f32.mrb[63].mxu1 }
 0x5fc   : > { %v2512_v20 = vadd.f32 %v2824_v24, %v2334_v3  ;;  %v2827_v55 = vadd.f32 %v2826_v51, %v2825_v7  ;;  %2850 = vmatpush3.bf16.msra.mxu1 %v2540_v50 }
 0x5fd   : > { %2851 = vmatprep.subr.bf16.mxu1 %v2955_v13 }
 0x5fe   : > { %v2515_v61 = vadd.f32 %v2827_v55, %v2339_v56  ;;  %v2532_v63 = vmax.f32 %v2512_v20, 0.0 }
 0x600   : > { %v2533_v33 = vmax.f32 %v2515_v61, 0.0 }
 0x602   : > { %v2541_v36 = vpack.c.bf16 %v2533_v33, %v2532_v63 }
 0x604   : > { %2852 = vmatpush3.bf16.msra.mxu1 %v2541_v36 }
 0x607   : > { %2854 = vmatmul.mubr.bf16.vlgmr.msra.gmra.mrb[64].mxu1 %v2937_v62 }
 0x6da   : > { %v2596_v6 = vpop.f32.mrb[64].mxu1 }
 0x6db   : > { %v2597_v9 = vadd.f32 %v2596_v6, %v2549_v5  ;;  %v2855_v11 = vpop.f32.mrb[65].mxu1 }
 0x6dc   : > { %v2599_v52 = vpop.f32.mrb[66].mxu1 }
 0x6dd   : > { %v2603_v47 = vmax.f32 %v2597_v9, 0.0  ;;  %v2600_v23 = vadd.f32 %v2599_v52, %v2554_v8  ;;  %v2856_v41 = vpop.f32.mrb[67].mxu1 }
 0x6df   : > { %v2604_v13 = vmax.f32 %v2600_v23, 0.0  ;;  %v2606_v21 = vsel %vm2605_vm4, %v2603_v47, -inf }
 0x6e1   : > { %v2608_v25 = vsel %vm2607_vm5, %v2604_v13, -inf }
 0x6e2   : > { %v2609_v27 = vmax.f32 %v2606_v21, %v2608_v25 }
 0x6e4   : > { %v2610_v14 = vrot.slane %v2609_v27, 4 }
 0x6e6   : > { %v2611_v59 = vmax.f32 %v2609_v27, %v2610_v14 }
 0x6e8   : > { %v2612_v26 = vrot.slane %v2611_v59, 2 }
 0x6ea   : > { %v2613_v35 = vmax.f32 %v2611_v59, %v2612_v26 }
 0x6ec   : > { %v2614_v17 = vrot.slane %v2613_v35, 1 }
 0x6ee   : > { %v2615_v10 = vmax.f32 %v2613_v35, %v2614_v17 }
 0x6f0   : > { %v2616_v30 = vsub.f32 %v2603_v47, %v2615_v10  ;;  %v2617_v31 = vsub.f32 %v2604_v13, %v2615_v10 }
 0x6f2   : > { %v2618_v4 = vmul.f32 1.442695, %v2616_v30  ;;  %v2620_v0 = vmul.f32 1.442695, %v2617_v31 }
 0x6f4   : > { %2938 = vpow2.f32 %v2618_v4 }
 0x6f5   : > { %2940 = vpow2.f32 %v2620_v0 }
 0x6fe   : > { %v2939_v46 = vpop.eup %2938 }
 0x6ff   : > { %v2941_v60 = vpop.eup %2940  ;;  %v2622_v15 = vsel %vm2605_vm4, %v2939_v46, 0.0 }
 0x700   : > { %v2623_v16 = vsel %vm2607_vm5, %v2941_v60, 0.0 }
 0x701   : > { %v2624_v29 = vadd.f32 %v2623_v16, %v2622_v15 }
 0x703   : > { %v2625_v37 = vrot.slane %v2624_v29, 4 }
 0x705   : > { %v2626_v38 = vadd.f32 %v2625_v37, %v2624_v29 }
 0x707   : > { %v2627_v22 = vrot.slane %v2626_v38, 2 }
 0x709   : > { %v2628_v18 = vadd.f32 %v2627_v22, %v2626_v38 }
 0x70b   : > { %v2629_v58 = vrot.slane %v2628_v18, 1 }
 0x70d   : > { %v2630_v53 = vadd.f32 %v2629_v58, %v2628_v18 }
 0x70f   : > { %2942 = vlog2.f32 %v2630_v53 }
 0x719   : > { %v2943_v19 = vpop.eup %2942 }
 0x71a   : > { %v2632_v54 = vmul.f32 0.6931472, %v2943_v19 }
 0x71c   : > { %v2633_v34 = vsub.f32 %v2616_v30, %v2632_v54  ;;  %v2634_v43 = vsub.f32 %v2617_v31, %v2632_v54 }
 0x71e   : > { %2635 = vst.msk [vmem:[%s467_s28] sm:$0xff] %vm2605_vm4, %v2633_v34 }
 0x71f   : > { %2636 = vst.msk [vmem:[%s467_s28 + $0x8] sm:$0x3] %vm2607_vm5, %v2634_v43 }
 0x720 PF: > { %s24_s29 = sadd.s32 1, %s2950_s29  }
 0x721   : > { %p21_p4 = scmp.ge.s32.totalorder %s24_s29, 4  }
 0x723   :  { %23 = sbr.rel (!%p21_p4) target bundleno = 1 (0x1), region = 106 }

</bundles_post_ra>
